<compile_context>
chip_gen: v7x
topology: tpu7x:2x2x1
jax: 0.10.0
libtpu: 0.0.40
codegen_flags: <defaults>
</compile_context>

<pallas_src>
import functools

import jax
import jax.numpy as jnp
from jax import lax
from jax.experimental import pallas as pl
from jax.experimental.pallas import tpu as pltpu


# ------------------------- packed small-vector layout --------------------------
def pack_layout(hidden_size):
    """128-lane-aligned offsets for all small (1,N) parameter vectors."""
    sizes = [("b_lstm", 8 * hidden_size),
             ("b1", 400), ("g1", 400), ("be1", 400),
             ("b2", 100), ("g2", 100), ("be2", 100),
             ("b3", 3)]
    layout = {}
    off = 0
    for name, n in sizes:
        layout[name] = (off, n)
        off += ((n + 127) // 128) * 128
    return layout, off


# --------------------------- fused forward kernel ------------------------------
def fused_kernel(batch_ref, idx_ref, emb_ref, w_ih_ref, w_hh_ref,
                 w1_ref, w2_ref, w3_ref, vec_ref, out_ref,
                 *, T, Bp, H, V, offs):
    # batch_ref: SMEM (1,) int32 -- real (unpadded) batch size
    # idx_ref:   (T*Bp, 2) int32 -- col 0: premise token id in [0,V),
    #                               col 1: hypothesis token id + V (two-hot column)
    # emb_ref:   (2V, 2E)  bf16 block-diag embedding table
    # w_ih_ref:  (2E, 8H)  bf16 stacked input->gates weights
    # w_hh_ref:  (2H, 8H)  bf16 stacked hidden->gates weights
    # w1/w2/w3:  bf16 MLP weights, (in, out) layout
    # vec_ref:   (1, L) f32 packed biases / BN gamma / BN beta
    # out_ref:   (Bp, 3) f32 softmax probabilities
    f32 = jnp.float32
    bf16 = jnp.bfloat16
    TB = T * Bp
    H2 = 2 * H

    def vec(name):
        off, n = offs[name]
        return vec_ref[:, off:off + n]

    # ---- fused embedding lookup (two-hot MXU matmul) + hoisted input proj ----
    col = lax.broadcasted_iota(jnp.int32, (TB, 2 * V), 1)
    two_hot = jnp.logical_or(col == idx_ref[:, 0:1],
                             col == idx_ref[:, 1:2]).astype(bf16)         # (TB, 2V)
    x = jnp.dot(two_hot, emb_ref[...], preferred_element_type=f32)        # (TB, 2E)
    gx = jnp.dot(x.astype(bf16), w_ih_ref[...],
                 preferred_element_type=f32) + vec("b_lstm")               # (TB, 8H)

    # ---- stacked block-diagonal LSTM recurrence (both encoders at once) ----
    w_hh = w_hh_ref[...]
    h = jnp.zeros((Bp, H2), f32)
    c = jnp.zeros((Bp, H2), f32)
    for t in range(T):  # T small & static: fully unrolled serial recurrence
        gates = gx[t * Bp:(t + 1) * Bp, :] + jnp.dot(
            h.astype(bf16), w_hh, preferred_element_type=f32)              # (Bp, 8H)
        sg = jax.nn.sigmoid(gates)   # full-tile EUP pass
        tg = jnp.tanh(gates)         # full-tile EUP pass
        i = sg[:, 0 * H2:1 * H2]     # [i_p | i_h]
        f = sg[:, 1 * H2:2 * H2]     # [f_p | f_h]
        g = tg[:, 2 * H2:3 * H2]     # [g_p | g_h]
        o = sg[:, 3 * H2:4 * H2]     # [o_p | o_h]
        c = f * c + i * g
        h = o * jnp.tanh(c)
    # h is already [h_prem | h_hypo]  (Bp, 2H) -- concat is free.

    # ---- MLP head; BatchNorm (train mode) over REAL batch rows only ----
    nb = batch_ref[0]
    nb_f = nb.astype(f32)
    rmask = (lax.broadcasted_iota(jnp.int32, (Bp, 1), 0) < nb).astype(f32)
    eps = 1e-5

    def bn_relu(y, gamma, beta):
        mu = jnp.sum(y * rmask, axis=0, keepdims=True) / nb_f
        d = y - mu
        var = jnp.sum(d * d * rmask, axis=0, keepdims=True) / nb_f
        return jnp.maximum(d * lax.rsqrt(var + eps) * gamma + beta, 0.0)

    y1 = jnp.dot(h.astype(bf16), w1_ref[...], preferred_element_type=f32) + vec("b1")
    y1 = bn_relu(y1, vec("g1"), vec("be1"))
    y2 = jnp.dot(y1.astype(bf16), w2_ref[...], preferred_element_type=f32) + vec("b2")
    y2 = bn_relu(y2, vec("g2"), vec("be2"))
    y3 = jnp.dot(y2.astype(bf16), w3_ref[...], preferred_element_type=f32) + vec("b3")

    # nn.Softmax() on a 2-D input -> softmax over dim=1 (classes)
    m = jnp.max(y3, axis=-1, keepdims=True)
    e = jnp.exp(y3 - m)
    out_ref[...] = e / jnp.sum(e, axis=-1, keepdims=True)


# ---------------------------- parameters ----------------------------------------
def init_params(key, emb_size, hidden_size, vocab_size):
    ks = jax.random.split(key, 16)
    V = vocab_size + 4
    E, H = emb_size, hidden_size

    def u(k, shape):
        return jax.random.uniform(k, shape, jnp.float32, -0.1, 0.1)

    def n(k, shape):
        return 0.02 * jax.random.normal(k, shape, jnp.float32)

    emb_prem = u(ks[0], (V, E))
    emb_hypo = u(ks[1], (V, E))

    def lstm_raw(k):
        k1, k2, k3, k4 = jax.random.split(k, 4)
        w_ih = u(k1, (4 * H, E))      # PyTorch layout (4H, E), rows i,f,g,o
        w_hh = u(k2, (4 * H, H))      # (4H, H)
        b_ih = u(k3, (4 * H,))
        b_hh = u(k4, (4 * H,))
        return w_ih.T, w_hh.T, (b_ih + b_hh)   # (E,4H), (H,4H), (4H,)

    wip, whp, bp = lstm_raw(ks[2])
    wih, whh, bh = lstm_raw(ks[3])

    # Stacked block-diagonal LSTM weights, gate-interleaved columns:
    #   [i_p | i_h | f_p | f_h | g_p | g_h | o_p | o_h], each H wide.
    w_ih_blk = jnp.zeros((2 * E, 8 * H), jnp.float32)
    w_hh_blk = jnp.zeros((2 * H, 8 * H), jnp.float32)
    b_blk = jnp.zeros((8 * H,), jnp.float32)
    for gi in range(4):
        cp = slice((2 * gi) * H, (2 * gi + 1) * H)       # prem cols of gate gi
        ch = slice((2 * gi + 1) * H, (2 * gi + 2) * H)   # hypo cols of gate gi
        src = slice(gi * H, (gi + 1) * H)
        w_ih_blk = w_ih_blk.at[:E, cp].set(wip[:, src])
        w_ih_blk = w_ih_blk.at[E:, ch].set(wih[:, src])
        w_hh_blk = w_hh_blk.at[:H, cp].set(whp[:, src])
        w_hh_blk = w_hh_blk.at[H:, ch].set(whh[:, src])
        b_blk = b_blk.at[cp].set(bp[src])
        b_blk = b_blk.at[ch].set(bh[src])

    # Block-diagonal embedding table: two-hot lookup yields [x_prem | x_hypo].
    emb_blk = jnp.zeros((2 * V, 2 * E), jnp.float32)
    emb_blk = emb_blk.at[:V, :E].set(emb_prem)
    emb_blk = emb_blk.at[V:, E:].set(emb_hypo)

    h2 = 2 * H
    w1 = n(ks[4], (400, h2)).T
    g1 = n(ks[5], (1, 400))
    w2 = n(ks[6], (100, 400)).T
    g2 = n(ks[7], (1, 100))
    w3 = n(ks[8], (3, 100)).T

    # Pack all small vectors into one lane-aligned parameter array.
    layout, total = pack_layout(H)
    vec_dict = {
        "b_lstm": b_blk,
        "b1": jnp.zeros((400,), jnp.float32), "g1": g1, "be1": jnp.zeros((400,), jnp.float32),
        "b2": jnp.zeros((100,), jnp.float32), "g2": g2, "be2": jnp.zeros((100,), jnp.float32),
        "b3": jnp.zeros((3,), jnp.float32),
    }
    packed = jnp.zeros((1, total), jnp.float32)
    for name, (off, nlen) in layout.items():
        packed = packed.at[:, off:off + nlen].set(vec_dict[name].reshape(1, nlen))

    return {
        "emb_blk": emb_blk.astype(jnp.bfloat16),
        "w_ih_blk": w_ih_blk.astype(jnp.bfloat16),
        "w_hh_blk": w_hh_blk.astype(jnp.bfloat16),
        "w1": w1.astype(jnp.bfloat16),
        "w2": w2.astype(jnp.bfloat16),
        "w3": w3.astype(jnp.bfloat16),
        "vec": packed,
    }


# ------------------------------ forward ------------------------------------------
def baseline_lstm_forward(params, premise_idx, hypothesis_idx):
    B, T = premise_idx.shape
    Bp = max(8, ((B + 7) // 8) * 8)          # pad batch to full 8-row sublane tile
    V = params["emb_blk"].shape[0] // 2
    H = params["w_hh_blk"].shape[0] // 2
    layout, _ = pack_layout(H)

    # Only tiny int32 glue stays outside the kernel (time-major flatten + pad).
    idx_p = premise_idx.astype(jnp.int32).T          # (T, B)
    idx_h = hypothesis_idx.astype(jnp.int32).T
    pad = Bp - B
    if pad:
        idx_p = jnp.pad(idx_p, ((0, 0), (0, pad)))
        idx_h = jnp.pad(idx_h, ((0, 0), (0, pad)))
    idx2 = jnp.stack([idx_p.reshape(T * Bp), idx_h.reshape(T * Bp) + V], axis=1)

    batch_arr = jnp.array([B], jnp.int32)            # SMEM scalar (real batch)

    args = (batch_arr, idx2,
            params["emb_blk"], params["w_ih_blk"], params["w_hh_blk"],
            params["w1"], params["w2"], params["w3"], params["vec"])

    probs = pl.pallas_call(
        functools.partial(fused_kernel, T=T, Bp=Bp, H=H, V=V, offs=layout),
        out_shape=jax.ShapeDtypeStruct((Bp, 3), jnp.float32),
        in_specs=[pl.BlockSpec(memory_space=pltpu.MemorySpace.SMEM)]
                 + [pl.BlockSpec(memory_space=pltpu.MemorySpace.VMEM)] * (len(args) - 1),
        out_specs=pl.BlockSpec(memory_space=pltpu.MemorySpace.VMEM),
    )(*args)
    return probs[:B]                                  # (B, 3) probabilities


if __name__ == "__main__":
    key = jax.random.PRNGKey(0)
    emb_size = 32
    hidden_size = 32
    maxlen = 8
    vocab_size = 100
    batch = 2

    kp, kh, kparams = jax.random.split(key, 3)
    premise_idx = jax.random.randint(kp, (batch, maxlen), 0, vocab_size + 4, dtype=jnp.int32)
    hypothesis_idx = jax.random.randint(kh, (batch, maxlen), 0, vocab_size + 4, dtype=jnp.int32)

    params = init_params(kparams, emb_size, hidden_size, vocab_size)

    fwd = jax.jit(baseline_lstm_forward)
    probs = fwd(params, premise_idx, hypothesis_idx)
    probs = jax.block_until_ready(probs)

    assert probs.shape == (batch, 3)
    assert bool(jnp.all(jnp.isfinite(probs)))
    assert bool(jnp.all(jnp.abs(jnp.sum(probs, axis=-1) - 1.0) < 1e-4))
    print("KERNEL_OK")
</pallas_src>

<mosaic_0001>
module attributes {stable_mosaic.version = 11 : i64} {
  func.func @fused_kernel(%arg0: memref<1xi32, #tpu.memory_space<smem>>, %arg1: memref<64x2xi32, #tpu.memory_space<vmem>>, %arg2: memref<208x64xbf16, #tpu.memory_space<vmem>>, %arg3: memref<64x256xbf16, #tpu.memory_space<vmem>>, %arg4: memref<64x256xbf16, #tpu.memory_space<vmem>>, %arg5: memref<64x400xbf16, #tpu.memory_space<vmem>>, %arg6: memref<400x100xbf16, #tpu.memory_space<vmem>>, %arg7: memref<100x3xbf16, #tpu.memory_space<vmem>>, %arg8: memref<1x2304xf32, #tpu.memory_space<vmem>>, %arg9: memref<8x3xf32, #tpu.memory_space<vmem>>) attributes {dimension_semantics = [], scalar_prefetch = 0 : i64, scratch_operands = 0 : i64, tpu.core_type = #tpu.core_type<tc>} {
    %0 = tpu.iota {dimensions = array<i32: 1>} : vector<64x208xi32>
    %c0 = arith.constant 0 : index
    %c0_0 = arith.constant 0 : index
    %1 = vector.load %arg1[%c0, %c0_0] : memref<64x2xi32, #tpu.memory_space<vmem>>, vector<64x1xi32>
    %2 = vector.broadcast %1 : vector<64x1xi32> to vector<64x208xi32>
    %3 = arith.cmpi eq, %0, %2 : vector<64x208xi32>
    %c0_1 = arith.constant 0 : index
    %c1 = arith.constant 1 : index
    %4 = vector.load %arg1[%c0_1, %c1] : memref<64x2xi32, #tpu.memory_space<vmem>>, vector<64x1xi32>
    %5 = vector.broadcast %4 : vector<64x1xi32> to vector<64x208xi32>
    %6 = arith.cmpi eq, %0, %5 : vector<64x208xi32>
    %7 = arith.ori %3, %6 : vector<64x208xi1>
    %8 = arith.extui %7 : vector<64x208xi1> to vector<64x208xi32>
    %9 = arith.sitofp %8 : vector<64x208xi32> to vector<64x208xf32>
    %10 = arith.truncf %9 : vector<64x208xf32> to vector<64x208xbf16>
    %c0_2 = arith.constant 0 : index
    %c0_3 = arith.constant 0 : index
    %11 = vector.load %arg2[%c0_2, %c0_3] : memref<208x64xbf16, #tpu.memory_space<vmem>>, vector<208x64xbf16>
    %cst = arith.constant dense<0.000000e+00> : vector<64x64xf32>
    %12 = tpu.matmul %10, %11, %cst {dimension_numbers = #tpu.dot_dimension_numbers<[1], [0], [0], [1], [0, 0, 1, 1], [], []>} : vector<64x208xbf16>, vector<208x64xbf16>, vector<64x64xf32> -> vector<64x64xf32>
    %13 = arith.truncf %12 : vector<64x64xf32> to vector<64x64xbf16>
    %c0_4 = arith.constant 0 : index
    %c0_5 = arith.constant 0 : index
    %14 = vector.load %arg3[%c0_4, %c0_5] : memref<64x256xbf16, #tpu.memory_space<vmem>>, vector<64x256xbf16>
    %cst_6 = arith.constant dense<0.000000e+00> : vector<64x256xf32>
    %15 = tpu.matmul %13, %14, %cst_6 {dimension_numbers = #tpu.dot_dimension_numbers<[1], [0], [0], [1], [0, 0, 1, 1], [], []>} : vector<64x64xbf16>, vector<64x256xbf16>, vector<64x256xf32> -> vector<64x256xf32>
    %c0_7 = arith.constant 0 : index
    %c0_8 = arith.constant 0 : index
    %16 = vector.load %arg8[%c0_7, %c0_8] : memref<1x2304xf32, #tpu.memory_space<vmem>>, vector<1x256xf32>
    %17 = vector.broadcast %16 : vector<1x256xf32> to vector<64x256xf32>
    %18 = arith.addf %15, %17 : vector<64x256xf32>
    %c0_9 = arith.constant 0 : index
    %c0_10 = arith.constant 0 : index
    %19 = vector.load %arg4[%c0_9, %c0_10] : memref<64x256xbf16, #tpu.memory_space<vmem>>, vector<64x256xbf16>
    %cst_11 = arith.constant 0.000000e+00 : f32
    %20 = vector.broadcast %cst_11 : f32 to vector<8x64xf32>
    %cst_12 = arith.constant 0.000000e+00 : f32
    %21 = vector.broadcast %cst_12 : f32 to vector<8x64xf32>
    %22 = vector.extract_strided_slice %18 {offsets = [0, 0], sizes = [8, 256], strides = [1, 1]} : vector<64x256xf32> to vector<8x256xf32>
    %23 = arith.truncf %20 : vector<8x64xf32> to vector<8x64xbf16>
    %cst_13 = arith.constant dense<0.000000e+00> : vector<8x256xf32>
    %24 = tpu.matmul %23, %19, %cst_13 {dimension_numbers = #tpu.dot_dimension_numbers<[1], [0], [0], [1], [0, 0, 1, 1], [], []>} : vector<8x64xbf16>, vector<64x256xbf16>, vector<8x256xf32> -> vector<8x256xf32>
    %25 = arith.addf %22, %24 : vector<8x256xf32>
    %26 = arith.negf %25 : vector<8x256xf32>
    %27 = math.exp %26 : vector<8x256xf32>
    %cst_14 = arith.constant 1.000000e+00 : f32
    %28 = vector.broadcast %cst_14 : f32 to vector<8x256xf32>
    %29 = arith.addf %28, %27 : vector<8x256xf32>
    %30 = arith.divf %28, %29 : vector<8x256xf32>
    %31 = math.tanh %25 : vector<8x256xf32>
    %32 = vector.extract_strided_slice %30 {offsets = [0, 0], sizes = [8, 64], strides = [1, 1]} : vector<8x256xf32> to vector<8x64xf32>
    %33 = vector.extract_strided_slice %30 {offsets = [0, 64], sizes = [8, 64], strides = [1, 1]} : vector<8x256xf32> to vector<8x64xf32>
    %34 = vector.extract_strided_slice %31 {offsets = [0, 128], sizes = [8, 64], strides = [1, 1]} : vector<8x256xf32> to vector<8x64xf32>
    %35 = vector.extract_strided_slice %30 {offsets = [0, 192], sizes = [8, 64], strides = [1, 1]} : vector<8x256xf32> to vector<8x64xf32>
    %36 = arith.mulf %33, %21 : vector<8x64xf32>
    %37 = arith.mulf %32, %34 : vector<8x64xf32>
    %38 = arith.addf %36, %37 : vector<8x64xf32>
    %39 = math.tanh %38 : vector<8x64xf32>
    %40 = arith.mulf %35, %39 : vector<8x64xf32>
    %41 = vector.extract_strided_slice %18 {offsets = [8, 0], sizes = [8, 256], strides = [1, 1]} : vector<64x256xf32> to vector<8x256xf32>
    %42 = arith.truncf %40 : vector<8x64xf32> to vector<8x64xbf16>
    %cst_15 = arith.constant dense<0.000000e+00> : vector<8x256xf32>
    %43 = tpu.matmul %42, %19, %cst_15 {dimension_numbers = #tpu.dot_dimension_numbers<[1], [0], [0], [1], [0, 0, 1, 1], [], []>} : vector<8x64xbf16>, vector<64x256xbf16>, vector<8x256xf32> -> vector<8x256xf32>
    %44 = arith.addf %41, %43 : vector<8x256xf32>
    %45 = arith.negf %44 : vector<8x256xf32>
    %46 = math.exp %45 : vector<8x256xf32>
    %cst_16 = arith.constant 1.000000e+00 : f32
    %47 = vector.broadcast %cst_16 : f32 to vector<8x256xf32>
    %48 = arith.addf %47, %46 : vector<8x256xf32>
    %49 = arith.divf %47, %48 : vector<8x256xf32>
    %50 = math.tanh %44 : vector<8x256xf32>
    %51 = vector.extract_strided_slice %49 {offsets = [0, 0], sizes = [8, 64], strides = [1, 1]} : vector<8x256xf32> to vector<8x64xf32>
    %52 = vector.extract_strided_slice %49 {offsets = [0, 64], sizes = [8, 64], strides = [1, 1]} : vector<8x256xf32> to vector<8x64xf32>
    %53 = vector.extract_strided_slice %50 {offsets = [0, 128], sizes = [8, 64], strides = [1, 1]} : vector<8x256xf32> to vector<8x64xf32>
    %54 = vector.extract_strided_slice %49 {offsets = [0, 192], sizes = [8, 64], strides = [1, 1]} : vector<8x256xf32> to vector<8x64xf32>
    %55 = arith.mulf %52, %38 : vector<8x64xf32>
    %56 = arith.mulf %51, %53 : vector<8x64xf32>
    %57 = arith.addf %55, %56 : vector<8x64xf32>
    %58 = math.tanh %57 : vector<8x64xf32>
    %59 = arith.mulf %54, %58 : vector<8x64xf32>
    %60 = vector.extract_strided_slice %18 {offsets = [16, 0], sizes = [8, 256], strides = [1, 1]} : vector<64x256xf32> to vector<8x256xf32>
    %61 = arith.truncf %59 : vector<8x64xf32> to vector<8x64xbf16>
    %cst_17 = arith.constant dense<0.000000e+00> : vector<8x256xf32>
    %62 = tpu.matmul %61, %19, %cst_17 {dimension_numbers = #tpu.dot_dimension_numbers<[1], [0], [0], [1], [0, 0, 1, 1], [], []>} : vector<8x64xbf16>, vector<64x256xbf16>, vector<8x256xf32> -> vector<8x256xf32>
    %63 = arith.addf %60, %62 : vector<8x256xf32>
    %64 = arith.negf %63 : vector<8x256xf32>
    %65 = math.exp %64 : vector<8x256xf32>
    %cst_18 = arith.constant 1.000000e+00 : f32
    %66 = vector.broadcast %cst_18 : f32 to vector<8x256xf32>
    %67 = arith.addf %66, %65 : vector<8x256xf32>
    %68 = arith.divf %66, %67 : vector<8x256xf32>
    %69 = math.tanh %63 : vector<8x256xf32>
    %70 = vector.extract_strided_slice %68 {offsets = [0, 0], sizes = [8, 64], strides = [1, 1]} : vector<8x256xf32> to vector<8x64xf32>
    %71 = vector.extract_strided_slice %68 {offsets = [0, 64], sizes = [8, 64], strides = [1, 1]} : vector<8x256xf32> to vector<8x64xf32>
    %72 = vector.extract_strided_slice %69 {offsets = [0, 128], sizes = [8, 64], strides = [1, 1]} : vector<8x256xf32> to vector<8x64xf32>
    %73 = vector.extract_strided_slice %68 {offsets = [0, 192], sizes = [8, 64], strides = [1, 1]} : vector<8x256xf32> to vector<8x64xf32>
    %74 = arith.mulf %71, %57 : vector<8x64xf32>
    %75 = arith.mulf %70, %72 : vector<8x64xf32>
    %76 = arith.addf %74, %75 : vector<8x64xf32>
    %77 = math.tanh %76 : vector<8x64xf32>
    %78 = arith.mulf %73, %77 : vector<8x64xf32>
    %79 = vector.extract_strided_slice %18 {offsets = [24, 0], sizes = [8, 256], strides = [1, 1]} : vector<64x256xf32> to vector<8x256xf32>
    %80 = arith.truncf %78 : vector<8x64xf32> to vector<8x64xbf16>
    %cst_19 = arith.constant dense<0.000000e+00> : vector<8x256xf32>
    %81 = tpu.matmul %80, %19, %cst_19 {dimension_numbers = #tpu.dot_dimension_numbers<[1], [0], [0], [1], [0, 0, 1, 1], [], []>} : vector<8x64xbf16>, vector<64x256xbf16>, vector<8x256xf32> -> vector<8x256xf32>
    %82 = arith.addf %79, %81 : vector<8x256xf32>
    %83 = arith.negf %82 : vector<8x256xf32>
    %84 = math.exp %83 : vector<8x256xf32>
    %cst_20 = arith.constant 1.000000e+00 : f32
    %85 = vector.broadcast %cst_20 : f32 to vector<8x256xf32>
    %86 = arith.addf %85, %84 : vector<8x256xf32>
    %87 = arith.divf %85, %86 : vector<8x256xf32>
    %88 = math.tanh %82 : vector<8x256xf32>
    %89 = vector.extract_strided_slice %87 {offsets = [0, 0], sizes = [8, 64], strides = [1, 1]} : vector<8x256xf32> to vector<8x64xf32>
    %90 = vector.extract_strided_slice %87 {offsets = [0, 64], sizes = [8, 64], strides = [1, 1]} : vector<8x256xf32> to vector<8x64xf32>
    %91 = vector.extract_strided_slice %88 {offsets = [0, 128], sizes = [8, 64], strides = [1, 1]} : vector<8x256xf32> to vector<8x64xf32>
    %92 = vector.extract_strided_slice %87 {offsets = [0, 192], sizes = [8, 64], strides = [1, 1]} : vector<8x256xf32> to vector<8x64xf32>
    %93 = arith.mulf %90, %76 : vector<8x64xf32>
    %94 = arith.mulf %89, %91 : vector<8x64xf32>
    %95 = arith.addf %93, %94 : vector<8x64xf32>
    %96 = math.tanh %95 : vector<8x64xf32>
    %97 = arith.mulf %92, %96 : vector<8x64xf32>
    %98 = vector.extract_strided_slice %18 {offsets = [32, 0], sizes = [8, 256], strides = [1, 1]} : vector<64x256xf32> to vector<8x256xf32>
    %99 = arith.truncf %97 : vector<8x64xf32> to vector<8x64xbf16>
    %cst_21 = arith.constant dense<0.000000e+00> : vector<8x256xf32>
    %100 = tpu.matmul %99, %19, %cst_21 {dimension_numbers = #tpu.dot_dimension_numbers<[1], [0], [0], [1], [0, 0, 1, 1], [], []>} : vector<8x64xbf16>, vector<64x256xbf16>, vector<8x256xf32> -> vector<8x256xf32>
    %101 = arith.addf %98, %100 : vector<8x256xf32>
    %102 = arith.negf %101 : vector<8x256xf32>
    %103 = math.exp %102 : vector<8x256xf32>
    %cst_22 = arith.constant 1.000000e+00 : f32
    %104 = vector.broadcast %cst_22 : f32 to vector<8x256xf32>
    %105 = arith.addf %104, %103 : vector<8x256xf32>
    %106 = arith.divf %104, %105 : vector<8x256xf32>
    %107 = math.tanh %101 : vector<8x256xf32>
    %108 = vector.extract_strided_slice %106 {offsets = [0, 0], sizes = [8, 64], strides = [1, 1]} : vector<8x256xf32> to vector<8x64xf32>
    %109 = vector.extract_strided_slice %106 {offsets = [0, 64], sizes = [8, 64], strides = [1, 1]} : vector<8x256xf32> to vector<8x64xf32>
    %110 = vector.extract_strided_slice %107 {offsets = [0, 128], sizes = [8, 64], strides = [1, 1]} : vector<8x256xf32> to vector<8x64xf32>
    %111 = vector.extract_strided_slice %106 {offsets = [0, 192], sizes = [8, 64], strides = [1, 1]} : vector<8x256xf32> to vector<8x64xf32>
    %112 = arith.mulf %109, %95 : vector<8x64xf32>
    %113 = arith.mulf %108, %110 : vector<8x64xf32>
    %114 = arith.addf %112, %113 : vector<8x64xf32>
    %115 = math.tanh %114 : vector<8x64xf32>
    %116 = arith.mulf %111, %115 : vector<8x64xf32>
    %117 = vector.extract_strided_slice %18 {offsets = [40, 0], sizes = [8, 256], strides = [1, 1]} : vector<64x256xf32> to vector<8x256xf32>
    %118 = arith.truncf %116 : vector<8x64xf32> to vector<8x64xbf16>
    %cst_23 = arith.constant dense<0.000000e+00> : vector<8x256xf32>
    %119 = tpu.matmul %118, %19, %cst_23 {dimension_numbers = #tpu.dot_dimension_numbers<[1], [0], [0], [1], [0, 0, 1, 1], [], []>} : vector<8x64xbf16>, vector<64x256xbf16>, vector<8x256xf32> -> vector<8x256xf32>
    %120 = arith.addf %117, %119 : vector<8x256xf32>
    %121 = arith.negf %120 : vector<8x256xf32>
    %122 = math.exp %121 : vector<8x256xf32>
    %cst_24 = arith.constant 1.000000e+00 : f32
    %123 = vector.broadcast %cst_24 : f32 to vector<8x256xf32>
    %124 = arith.addf %123, %122 : vector<8x256xf32>
    %125 = arith.divf %123, %124 : vector<8x256xf32>
    %126 = math.tanh %120 : vector<8x256xf32>
    %127 = vector.extract_strided_slice %125 {offsets = [0, 0], sizes = [8, 64], strides = [1, 1]} : vector<8x256xf32> to vector<8x64xf32>
    %128 = vector.extract_strided_slice %125 {offsets = [0, 64], sizes = [8, 64], strides = [1, 1]} : vector<8x256xf32> to vector<8x64xf32>
    %129 = vector.extract_strided_slice %126 {offsets = [0, 128], sizes = [8, 64], strides = [1, 1]} : vector<8x256xf32> to vector<8x64xf32>
    %130 = vector.extract_strided_slice %125 {offsets = [0, 192], sizes = [8, 64], strides = [1, 1]} : vector<8x256xf32> to vector<8x64xf32>
    %131 = arith.mulf %128, %114 : vector<8x64xf32>
    %132 = arith.mulf %127, %129 : vector<8x64xf32>
    %133 = arith.addf %131, %132 : vector<8x64xf32>
    %134 = math.tanh %133 : vector<8x64xf32>
    %135 = arith.mulf %130, %134 : vector<8x64xf32>
    %136 = vector.extract_strided_slice %18 {offsets = [48, 0], sizes = [8, 256], strides = [1, 1]} : vector<64x256xf32> to vector<8x256xf32>
    %137 = arith.truncf %135 : vector<8x64xf32> to vector<8x64xbf16>
    %cst_25 = arith.constant dense<0.000000e+00> : vector<8x256xf32>
    %138 = tpu.matmul %137, %19, %cst_25 {dimension_numbers = #tpu.dot_dimension_numbers<[1], [0], [0], [1], [0, 0, 1, 1], [], []>} : vector<8x64xbf16>, vector<64x256xbf16>, vector<8x256xf32> -> vector<8x256xf32>
    %139 = arith.addf %136, %138 : vector<8x256xf32>
    %140 = arith.negf %139 : vector<8x256xf32>
    %141 = math.exp %140 : vector<8x256xf32>
    %cst_26 = arith.constant 1.000000e+00 : f32
    %142 = vector.broadcast %cst_26 : f32 to vector<8x256xf32>
    %143 = arith.addf %142, %141 : vector<8x256xf32>
    %144 = arith.divf %142, %143 : vector<8x256xf32>
    %145 = math.tanh %139 : vector<8x256xf32>
    %146 = vector.extract_strided_slice %144 {offsets = [0, 0], sizes = [8, 64], strides = [1, 1]} : vector<8x256xf32> to vector<8x64xf32>
    %147 = vector.extract_strided_slice %144 {offsets = [0, 64], sizes = [8, 64], strides = [1, 1]} : vector<8x256xf32> to vector<8x64xf32>
    %148 = vector.extract_strided_slice %145 {offsets = [0, 128], sizes = [8, 64], strides = [1, 1]} : vector<8x256xf32> to vector<8x64xf32>
    %149 = vector.extract_strided_slice %144 {offsets = [0, 192], sizes = [8, 64], strides = [1, 1]} : vector<8x256xf32> to vector<8x64xf32>
    %150 = arith.mulf %147, %133 : vector<8x64xf32>
    %151 = arith.mulf %146, %148 : vector<8x64xf32>
    %152 = arith.addf %150, %151 : vector<8x64xf32>
    %153 = math.tanh %152 : vector<8x64xf32>
    %154 = arith.mulf %149, %153 : vector<8x64xf32>
    %155 = vector.extract_strided_slice %18 {offsets = [56, 0], sizes = [8, 256], strides = [1, 1]} : vector<64x256xf32> to vector<8x256xf32>
    %156 = arith.truncf %154 : vector<8x64xf32> to vector<8x64xbf16>
    %cst_27 = arith.constant dense<0.000000e+00> : vector<8x256xf32>
    %157 = tpu.matmul %156, %19, %cst_27 {dimension_numbers = #tpu.dot_dimension_numbers<[1], [0], [0], [1], [0, 0, 1, 1], [], []>} : vector<8x64xbf16>, vector<64x256xbf16>, vector<8x256xf32> -> vector<8x256xf32>
    %158 = arith.addf %155, %157 : vector<8x256xf32>
    %159 = arith.negf %158 : vector<8x256xf32>
    %160 = math.exp %159 : vector<8x256xf32>
    %cst_28 = arith.constant 1.000000e+00 : f32
    %161 = vector.broadcast %cst_28 : f32 to vector<8x256xf32>
    %162 = arith.addf %161, %160 : vector<8x256xf32>
    %163 = arith.divf %161, %162 : vector<8x256xf32>
    %164 = math.tanh %158 : vector<8x256xf32>
    %165 = vector.extract_strided_slice %163 {offsets = [0, 0], sizes = [8, 64], strides = [1, 1]} : vector<8x256xf32> to vector<8x64xf32>
    %166 = vector.extract_strided_slice %163 {offsets = [0, 64], sizes = [8, 64], strides = [1, 1]} : vector<8x256xf32> to vector<8x64xf32>
    %167 = vector.extract_strided_slice %164 {offsets = [0, 128], sizes = [8, 64], strides = [1, 1]} : vector<8x256xf32> to vector<8x64xf32>
    %168 = vector.extract_strided_slice %163 {offsets = [0, 192], sizes = [8, 64], strides = [1, 1]} : vector<8x256xf32> to vector<8x64xf32>
    %169 = arith.mulf %166, %152 : vector<8x64xf32>
    %170 = arith.mulf %165, %167 : vector<8x64xf32>
    %171 = arith.addf %169, %170 : vector<8x64xf32>
    %172 = math.tanh %171 : vector<8x64xf32>
    %173 = arith.mulf %168, %172 : vector<8x64xf32>
    %c0_29 = arith.constant 0 : index
    %174 = memref.load %arg0[%c0_29] : memref<1xi32, #tpu.memory_space<smem>>
    %175 = arith.sitofp %174 : i32 to f32
    %176 = tpu.iota {dimensions = array<i32: 0>} : vector<8x1xi32>
    %177 = vector.broadcast %174 : i32 to vector<8x1xi32>
    %178 = arith.cmpi slt, %176, %177 : vector<8x1xi32>
    %179 = arith.extui %178 : vector<8x1xi1> to vector<8x1xi32>
    %180 = arith.sitofp %179 : vector<8x1xi32> to vector<8x1xf32>
    %181 = arith.truncf %173 : vector<8x64xf32> to vector<8x64xbf16>
    %c0_30 = arith.constant 0 : index
    %c0_31 = arith.constant 0 : index
    %182 = vector.load %arg5[%c0_30, %c0_31] : memref<64x400xbf16, #tpu.memory_space<vmem>>, vector<64x400xbf16>
    %cst_32 = arith.constant dense<0.000000e+00> : vector<8x400xf32>
    %183 = tpu.matmul %181, %182, %cst_32 {dimension_numbers = #tpu.dot_dimension_numbers<[1], [0], [0], [1], [0, 0, 1, 1], [], []>} : vector<8x64xbf16>, vector<64x400xbf16>, vector<8x400xf32> -> vector<8x400xf32>
    %c0_33 = arith.constant 0 : index
    %c256 = arith.constant 256 : index
    %184 = vector.load %arg8[%c0_33, %c256] : memref<1x2304xf32, #tpu.memory_space<vmem>>, vector<1x400xf32>
    %185 = vector.broadcast %184 : vector<1x400xf32> to vector<8x400xf32>
    %186 = arith.addf %183, %185 : vector<8x400xf32>
    %c0_34 = arith.constant 0 : index
    %c768 = arith.constant 768 : index
    %187 = vector.load %arg8[%c0_34, %c768] : memref<1x2304xf32, #tpu.memory_space<vmem>>, vector<1x400xf32>
    %c0_35 = arith.constant 0 : index
    %c1280 = arith.constant 1280 : index
    %188 = vector.load %arg8[%c0_35, %c1280] : memref<1x2304xf32, #tpu.memory_space<vmem>>, vector<1x400xf32>
    %189 = vector.broadcast %180 : vector<8x1xf32> to vector<8x400xf32>
    %190 = arith.mulf %186, %189 : vector<8x400xf32>
    %cst_36 = arith.constant dense<0.000000e+00> : vector<400xf32>
    %191 = vector.multi_reduction <add>, %190, %cst_36 [0] : vector<8x400xf32> to vector<400xf32>
    %192 = vector.shape_cast %191 : vector<400xf32> to vector<1x400xf32>
    %193 = vector.broadcast %175 : f32 to vector<1x400xf32>
    %194 = arith.divf %192, %193 : vector<1x400xf32>
    %195 = vector.broadcast %194 : vector<1x400xf32> to vector<8x400xf32>
    %196 = arith.subf %186, %195 : vector<8x400xf32>
    %197 = arith.mulf %196, %196 : vector<8x400xf32>
    %198 = vector.broadcast %180 : vector<8x1xf32> to vector<8x400xf32>
    %199 = arith.mulf %197, %198 : vector<8x400xf32>
    %cst_37 = arith.constant dense<0.000000e+00> : vector<400xf32>
    %200 = vector.multi_reduction <add>, %199, %cst_37 [0] : vector<8x400xf32> to vector<400xf32>
    %201 = vector.shape_cast %200 : vector<400xf32> to vector<1x400xf32>
    %202 = vector.broadcast %175 : f32 to vector<1x400xf32>
    %203 = arith.divf %201, %202 : vector<1x400xf32>
    %cst_38 = arith.constant 9.99999974E-6 : f32
    %204 = vector.broadcast %cst_38 : f32 to vector<1x400xf32>
    %205 = arith.addf %203, %204 : vector<1x400xf32>
    %206 = math.rsqrt %205 : vector<1x400xf32>
    %207 = vector.broadcast %206 : vector<1x400xf32> to vector<8x400xf32>
    %208 = arith.mulf %196, %207 : vector<8x400xf32>
    %209 = vector.broadcast %187 : vector<1x400xf32> to vector<8x400xf32>
    %210 = arith.mulf %208, %209 : vector<8x400xf32>
    %211 = vector.broadcast %188 : vector<1x400xf32> to vector<8x400xf32>
    %212 = arith.addf %210, %211 : vector<8x400xf32>
    %cst_39 = arith.constant 0.000000e+00 : f32
    %213 = vector.broadcast %cst_39 : f32 to vector<8x400xf32>
    %214 = arith.maximumf %212, %213 : vector<8x400xf32>
    %215 = arith.truncf %214 : vector<8x400xf32> to vector<8x400xbf16>
    %c0_40 = arith.constant 0 : index
    %c0_41 = arith.constant 0 : index
    %216 = vector.load %arg6[%c0_40, %c0_41] : memref<400x100xbf16, #tpu.memory_space<vmem>>, vector<400x100xbf16>
    %cst_42 = arith.constant dense<0.000000e+00> : vector<8x100xf32>
    %217 = tpu.matmul %215, %216, %cst_42 {dimension_numbers = #tpu.dot_dimension_numbers<[1], [0], [0], [1], [0, 0, 1, 1], [], []>} : vector<8x400xbf16>, vector<400x100xbf16>, vector<8x100xf32> -> vector<8x100xf32>
    %c0_43 = arith.constant 0 : index
    %c1792 = arith.constant 1792 : index
    %218 = vector.load %arg8[%c0_43, %c1792] : memref<1x2304xf32, #tpu.memory_space<vmem>>, vector<1x100xf32>
    %219 = vector.broadcast %218 : vector<1x100xf32> to vector<8x100xf32>
    %220 = arith.addf %217, %219 : vector<8x100xf32>
    %c0_44 = arith.constant 0 : index
    %c1920 = arith.constant 1920 : index
    %221 = vector.load %arg8[%c0_44, %c1920] : memref<1x2304xf32, #tpu.memory_space<vmem>>, vector<1x100xf32>
    %c0_45 = arith.constant 0 : index
    %c2048 = arith.constant 2048 : index
    %222 = vector.load %arg8[%c0_45, %c2048] : memref<1x2304xf32, #tpu.memory_space<vmem>>, vector<1x100xf32>
    %223 = vector.broadcast %180 : vector<8x1xf32> to vector<8x100xf32>
    %224 = arith.mulf %220, %223 : vector<8x100xf32>
    %cst_46 = arith.constant dense<0.000000e+00> : vector<100xf32>
    %225 = vector.multi_reduction <add>, %224, %cst_46 [0] : vector<8x100xf32> to vector<100xf32>
    %226 = vector.shape_cast %225 : vector<100xf32> to vector<1x100xf32>
    %227 = vector.broadcast %175 : f32 to vector<1x100xf32>
    %228 = arith.divf %226, %227 : vector<1x100xf32>
    %229 = vector.broadcast %228 : vector<1x100xf32> to vector<8x100xf32>
    %230 = arith.subf %220, %229 : vector<8x100xf32>
    %231 = arith.mulf %230, %230 : vector<8x100xf32>
    %232 = vector.broadcast %180 : vector<8x1xf32> to vector<8x100xf32>
    %233 = arith.mulf %231, %232 : vector<8x100xf32>
    %cst_47 = arith.constant dense<0.000000e+00> : vector<100xf32>
    %234 = vector.multi_reduction <add>, %233, %cst_47 [0] : vector<8x100xf32> to vector<100xf32>
    %235 = vector.shape_cast %234 : vector<100xf32> to vector<1x100xf32>
    %236 = vector.broadcast %175 : f32 to vector<1x100xf32>
    %237 = arith.divf %235, %236 : vector<1x100xf32>
    %cst_48 = arith.constant 9.99999974E-6 : f32
    %238 = vector.broadcast %cst_48 : f32 to vector<1x100xf32>
    %239 = arith.addf %237, %238 : vector<1x100xf32>
    %240 = math.rsqrt %239 : vector<1x100xf32>
    %241 = vector.broadcast %240 : vector<1x100xf32> to vector<8x100xf32>
    %242 = arith.mulf %230, %241 : vector<8x100xf32>
    %243 = vector.broadcast %221 : vector<1x100xf32> to vector<8x100xf32>
    %244 = arith.mulf %242, %243 : vector<8x100xf32>
    %245 = vector.broadcast %222 : vector<1x100xf32> to vector<8x100xf32>
    %246 = arith.addf %244, %245 : vector<8x100xf32>
    %cst_49 = arith.constant 0.000000e+00 : f32
    %247 = vector.broadcast %cst_49 : f32 to vector<8x100xf32>
    %248 = arith.maximumf %246, %247 : vector<8x100xf32>
    %249 = arith.truncf %248 : vector<8x100xf32> to vector<8x100xbf16>
    %c0_50 = arith.constant 0 : index
    %c0_51 = arith.constant 0 : index
    %250 = vector.load %arg7[%c0_50, %c0_51] : memref<100x3xbf16, #tpu.memory_space<vmem>>, vector<100x3xbf16>
    %cst_52 = arith.constant dense<0.000000e+00> : vector<8x3xf32>
    %251 = tpu.matmul %249, %250, %cst_52 {dimension_numbers = #tpu.dot_dimension_numbers<[1], [0], [0], [1], [0, 0, 1, 1], [], []>} : vector<8x100xbf16>, vector<100x3xbf16>, vector<8x3xf32> -> vector<8x3xf32>
    %c0_53 = arith.constant 0 : index
    %c2176 = arith.constant 2176 : index
    %252 = vector.load %arg8[%c0_53, %c2176] : memref<1x2304xf32, #tpu.memory_space<vmem>>, vector<1x3xf32>
    %253 = vector.broadcast %252 : vector<1x3xf32> to vector<8x3xf32>
    %254 = arith.addf %251, %253 : vector<8x3xf32>
    %cst_54 = arith.constant dense<0xFF800000> : vector<8xf32>
    %255 = vector.multi_reduction <maximumf>, %254, %cst_54 [1] : vector<8x3xf32> to vector<8xf32>
    %256 = vector.shape_cast %255 : vector<8xf32> to vector<8x1xf32>
    %257 = vector.broadcast %256 : vector<8x1xf32> to vector<8x3xf32>
    %258 = arith.subf %254, %257 : vector<8x3xf32>
    %259 = math.exp %258 : vector<8x3xf32>
    %cst_55 = arith.constant dense<0.000000e+00> : vector<8xf32>
    %260 = vector.multi_reduction <add>, %259, %cst_55 [1] : vector<8x3xf32> to vector<8xf32>
    %261 = vector.shape_cast %260 : vector<8xf32> to vector<8x1xf32>
    %262 = vector.broadcast %261 : vector<8x1xf32> to vector<8x3xf32>
    %263 = arith.divf %259, %262 : vector<8x3xf32>
    %c0_56 = arith.constant 0 : index
    %c0_57 = arith.constant 0 : index
    %264 = vector.load %arg9[%c0_56, %c0_57] : memref<8x3xf32, #tpu.memory_space<vmem>>, vector<8x3xf32>
    tpu.vector_store %arg9[%c0_56, %c0_57], %263 {strides = array<i32>} : memref<8x3xf32, #tpu.memory_space<vmem>>, vector<8x3xf32>,
    return
  }
}

</mosaic_0001>

<bundles_post_ra>
// kernel: baseline_lstm_forward.1
= control target key start
LH: loop header
LB: loop body
LE: loop exit
PB: predicated region body
PF: predicated region fallthrough
CT: control target
= control target key end

     0   :  { %15 = vsyncpa [#allocation4], 0  ;;  %s3098_s0 = inlined_call_operand.<no memory space> [shape: s32[1], index: 0, kind: input, shape index: {}]   ;;  %s3099_s1 = inlined_call_operand.vmem [shape: s32[64,2], index: 1, kind: input, shape index: {}]   ;;  %s3100_s2 = inlined_call_operand.vmem [shape: bf16[208,64], index: 2, kind: input, shape index: {}]   ;;  %s3101_s3 = inlined_call_operand.vmem [shape: bf16[64,256], index: 3, kind: input, shape index: {}]   ;;  %s3102_s4 = inlined_call_operand.hbm [shape: bf16[64,256], index: 4, kind: input, shape index: {}]   ;;  %s3103_s5 = inlined_call_operand.vmem [shape: bf16[64,400], index: 5, kind: input, shape index: {}]   ;;  %s3104_s6 = inlined_call_operand.vmem [shape: bf16[400,100], index: 6, kind: input, shape index: {}]   ;;  %s3105_s7 = inlined_call_operand.vmem [shape: bf16[100,3], index: 7, kind: input, shape index: {}]   ;;  %s3106_s8 = inlined_call_operand.hbm [shape: f32[1,2304], index: 8, kind: input, shape index: {}]   ;;  %s3107_s9 = inlined_call_operand.vmem [shape: f32[8,3], index: 9, kind: output, shape index: {}]  }
   0x1   :  { %16 = vsyncpa [#allocation6], 0  ;;  %s2451_s30 = smov [#allocation3]   ;;  %s2403_s13 = scalar_lea.hbm %s3102_s4, 1024 }
   0x2   :  { %s30_s10 = sshll.u32 %s2451_s30, 4  ;;  %p2404_p0 = scmp.ne.s32.totalorder %s3102_s4, %s2403_s13  ;;  %s31_s10 = int_to_ptr.vmem [resolvable:$true] %s30_s10 }
   0x3   :  { %p2407_p1 = scmp.lt.u32.totalorder %s2403_s13, %s3102_s4 }
   0x5   :  { %p2409_p2 = pnand %p2407_p1, %p2404_p0 }
   0x7   :  { %2412 = shalt.err (!%p2409_p2)
}
   0x8   :  { %s2413_s18 = scalar_lea.vmem %s31_s10, 1024  ;;  %p2418_p4 = scmp.lt.s32.totalorder %s31_s10, %s31_s10 }
   0x9   :  { %p2414_p3 = scmp.ne.s32.totalorder %s31_s10, %s2413_s18  ;;  %p2419_p5 = scmp.lt.s32.totalorder %s2413_s18, %s2413_s18 }
   0xb   :  { %p2420_p6 = por %p2419_p5, %p2418_p4 }
   0xd   :  { %p2421_p7 = pnand %p2420_p6, %p2414_p3 }
   0xf   :  { %2424 = shalt.err (!%p2421_p7)
}
  0x10   :  { %s2452_s19 = smov 128   ;;  %s2453_s20 = smov 8  }
  0x11   :  { %36 = dma.hbm_to_vmem [thread:$0]  %s3102_s4, 1024, %s31_s10, [#allocation4], %s2452_s19, %s2452_s19, %s2453_s20  }
  0x12   :  { %s2454_s23 = smov [#allocation5]   ;;  %s2425_s27 = scalar_lea.hbm %s3106_s8, 288 }
  0x13   :  { %s49_s24 = sshll.u32 %s2454_s23, 4  ;;  %p2426_p8 = scmp.ne.s32.totalorder %s3106_s8, %s2425_s27  ;;  %s50_s24 = int_to_ptr.vmem [resolvable:$true] %s49_s24 }
  0x14   :  { %p2429_p9 = scmp.lt.u32.totalorder %s2425_s27, %s3106_s8 }
  0x16   :  { %p2431_p10 = pnand %p2429_p9, %p2426_p8 }
  0x18   :  { %2434 = shalt.err (!%p2431_p10)
}
  0x19   :  { %s2435_s12 = scalar_lea.vmem %s50_s24, 288  ;;  %p2440_p12 = scmp.lt.s32.totalorder %s50_s24, %s50_s24 }
  0x1a   :  { %p2436_p11 = scmp.ne.s32.totalorder %s50_s24, %s2435_s12  ;;  %p2441_p13 = scmp.lt.s32.totalorder %s2435_s12, %s2435_s12 }
  0x1c   :  { %p2442_p0 = por %p2441_p13, %p2440_p12 }
  0x1e   :  { %p2443_p1 = pnand %p2442_p0, %p2436_p11 }
  0x20   :  { %2446 = shalt.err (!%p2443_p1)
}
  0x21   :  { %52 = dma.hbm_to_vmem [thread:$0]  %s3106_s8, 288, %s50_s24, [#allocation6]  }
  0x22   :  { %2447 = dma.done.wait [#allocation4], 1024  }
  0x23   :  { %2448 = vsyncadd [#allocation4], 4294966272 }
  0x24   :  { %2449 = dma.done.wait [#allocation6], 288  }
  0x25   :  { %2450 = vsyncadd [#allocation6], 4294967008  ;;  %v2455_v0 = vmov 1   ;;  %v2456_v1 = vmov 0   ;;  %v63_v2 = vld [vmem:[%s3099_s1] sm:$0xff]  ;;  %v64_v3 = vld [vmem:[%s3099_s1 + $0x8] sm:$0xff]  ;;  %v60_v29 = vlaneseq }
  0x26   :  { %2188 = vset.pattern.permute.xlu1 %v2455_v0  ;;  %2187 = vset.pattern.permute.xlu0 %v2456_v1  ;;  %v2198_v4 = vld [vmem:[%s3100_s2] sm:$0xff]   ;;  %v66_v5 = vld [vmem:[%s3099_s1 + $0x18] sm:$0xff]  ;;  %v65_v6 = vld [vmem:[%s3099_s1 + $0x10] sm:$0xff]  ;;  %v2457_v36 = vmov 0.0   ;;  %vm311_vm11 = vcmask 654336  }
  0x27   :  { %324 = vmatprep.subr.bf16.mxu0 %v2456_v1  ;;  %518 = vmatprep.mubr.bf16.mxu1 %v2456_v1  ;;  %v2199_v7 = vld [vmem:[%s3100_s2 + $0x8] sm:$0xff]   ;;  %v2200_v8 = vld [vmem:[%s3100_s2 + $0x10] sm:$0xff]   ;;  %v67_v10 = vld [vmem:[%s3099_s1 + $0x20] sm:$0xff]  ;;  %v2636_v30 = vand.u32 127, %v60_v29  ;;  %v2458_v42 = vmov 1.0|1.0  }
  0x28   :  { %112 = vperm.xlu1 %2188, %v63_v2   ;;  %72 = vperm.xlu0 %2187, %v63_v2   ;;  %v68_v9 = vld [vmem:[%s3099_s1 + $0x28] sm:$0xff]  ;;  %v2201_v11 = vld [vmem:[%s3100_s2 + $0x18] sm:$0xff]   ;;  %v69_v12 = vld [vmem:[%s3099_s1 + $0x30] sm:$0xff] }
  0x29   :  { %325 = vmatpush1.bf16.msra.mxu0 %v2198_v4  ;;  %v2202_v13 = vld [vmem:[%s3100_s2 + $0x20] sm:$0xff]   ;;  %v2203_v14 = vld [vmem:[%s3100_s2 + $0x28] sm:$0xff]   ;;  %v2204_v15 = vld [vmem:[%s3100_s2 + $0x30] sm:$0xff]   ;;  %v2639_v31 = vadd.s32 128, %v2636_v30 }
  0x2a   :  { %326 = vmatprep.subr.bf16.mxu0 %v2456_v1  ;;  %v70_v16 = vld [vmem:[%s3099_s1 + $0x38] sm:$0xff]  ;;  %v2206_v18 = vld [vmem:[%s3100_s2 + $0x40] sm:$0xff]   ;;  %v2207_v19 = vld [vmem:[%s3100_s2 + $0x48] sm:$0xff]  }
  0x2b   :  { %v2205_v17 = vld [vmem:[%s3100_s2 + $0x38] sm:$0xff]   ;;  %v2208_v20 = vld [vmem:[%s3100_s2 + $0x50] sm:$0xff]   ;;  %v2213_v21 = vld [vmem:[%s3101_s3 + $0x4] ss:$8 sps:$4 sm:$0xff]  }
  0x2c   :  { %115 = vperm.xlu1 %2188, %v64_v3   ;;  %75 = vperm.xlu0 %2187, %v64_v3   ;;  %v2209_v22 = vld [vmem:[%s3100_s2 + $0x58] sm:$0xff]   ;;  %v2211_v23 = vld [vmem:[%s3101_s3] ss:$8 sps:$4 sm:$0xff]   ;;  %v2219_v27 = vld [vmem:[%s3101_s3 + $0x24] ss:$8 sps:$4 sm:$0xff]  }
  0x2d   :  { %327 = vmatpush1.bf16.msra.mxu0 %v2199_v7  ;;  %v2216_v24 = vld [vmem:[%s3101_s3 + $0x14] ss:$8 sps:$4 sm:$0xff]   ;;  %2169 = vmatprep.subr.bf16.mxu1 %v2213_v21  ;;  %v2214_v25 = vld [vmem:[%s3101_s3 + $0x10] ss:$8 sps:$4 sm:$0xff]   ;;  %v2210_v26 = vld [vmem:[%s3100_s2 + $0x60] sm:$0xff]  }
  0x2e   :  { %328 = vmatprep.subr.bf16.mxu0 %v2456_v1  ;;  %2173 = vmatpush1.bf16.msra.mxu1 %v2211_v23  ;;  %v2217_v28 = vld [vmem:[%s3101_s3 + $0x20] ss:$8 sps:$4 sm:$0xff]   ;;  %v2220_v62 = vld [vmem:[%s3101_s3 + $0x30] ss:$8 sps:$4 sm:$0xff]   ;;  %v2222_v63 = vld [vmem:[%s3101_s3 + $0x34] ss:$8 sps:$4 sm:$0xff]  }
  0x2f   :  { %2170 = vmatprep.subr.bf16.mxu1 %v2216_v24  ;;  %v2700_v7 = vld [vmem:[#allocation3] ss:$8 sps:$4 sm:$0xff]   ;;  %s2459_s3 = smov 64  }
  0x30   :  { %2189 = vset.pattern.permute.xlu1 %v2456_v1  ;;  %2190 = vset.pattern.permute.xlu0 %v2455_v0 }
  0x31   :  { %81 = vperm.xlu1 %2189, %v66_v5   ;;  %118 = vperm.xlu0 %2190, %v65_v6  }
  0x32   :  { %329 = vmatpush1.bf16.msra.mxu0 %v2200_v8  ;;  %2174 = vmatpush1.bf16.msra.mxu1 %v2214_v25  ;;  %v2703_v8 = vld [vmem:[#allocation3 + $0x14] ss:$8 sps:$4 sm:$0xff]  }
  0x33   :  { %330 = vmatprep.subr.bf16.mxu0 %v2456_v1  ;;  %2171 = vmatprep.subr.bf16.mxu1 %v2219_v27 }
  0x35   :  { %2192 = vset.pattern.permute.xlu1 %v2455_v0  ;;  %2191 = vset.pattern.permute.xlu0 %v2456_v1 }
  0x36   :  { %121 = vperm.xlu1 %2192, %v66_v5   ;;  %78 = vperm.xlu0 %2191, %v65_v6  }
  0x37   :  { %331 = vmatpush1.bf16.msra.mxu0 %v2201_v11  ;;  %2175 = vmatpush1.bf16.msra.mxu1 %v2217_v28 }
  0x38   :  { %332 = vmatprep.subr.bf16.mxu0 %v2456_v1  ;;  %2172 = vmatprep.subr.bf16.mxu1 %v2222_v63 }
  0x3a   :  { %2193 = vset.pattern.permute.xlu1 %v2456_v1  ;;  %87 = vperm.xlu0 %2191, %v68_v9  }
  0x3b   :  { %84 = vperm.xlu1 %2193, %v67_v10   ;;  %333 = vmatpush1.bf16.msra.mxu0 %v2202_v13 }
  0x3c   :  { %334 = vmatprep.subr.bf16.mxu0 %v2456_v1  ;;  %2176 = vmatpush1.bf16.msra.mxu1 %v2220_v62 }
  0x3e   :  { %90 = vperm.xlu0 %2191, %v69_v12  }
  0x3f   :  { %2194 = vset.pattern.permute.xlu1 %v2455_v0  ;;  %335 = vmatpush1.bf16.msra.mxu0 %v2203_v14  ;;  %v2716_v14 = vld [vmem:[#allocation3 + $0x34] ss:$8 sps:$4 sm:$0xff]  }
  0x40   :  { %124 = vperm.xlu1 %2194, %v67_v10   ;;  %336 = vmatprep.subr.bf16.mxu0 %v2456_v1  ;;  %v2710_v10 = vld [vmem:[#allocation3 + $0x24] ss:$8 sps:$4 sm:$0xff]  }
  0x42   :  { %2196 = vset.pattern.permute.xlu0 %v2455_v0 }
  0x43   :  { %130 = vperm.xlu0 %2196, %v69_v12   ;;  %337 = vmatpush1.bf16.msra.mxu0 %v2204_v15  ;;  %v2714_v12 = vld [vmem:[#allocation3 + $0x20] ss:$8 sps:$4 sm:$0xff]  }
  0x44   :  { %127 = vperm.xlu1 %2194, %v68_v9   ;;  %338 = vmatprep.subr.bf16.mxu0 %v2456_v1  ;;  %v2708_v9 = vld [vmem:[#allocation3 + $0x10] ss:$8 sps:$4 sm:$0xff]  }
  0x47   :  { %339 = vmatpush1.bf16.msra.mxu0 %v2205_v17 }
  0x48   :  { %2195 = vset.pattern.permute.xlu1 %v2456_v1  ;;  %340 = vmatprep.subr.bf16.mxu0 %v2456_v1 }
  0x49   :  { %93 = vperm.xlu1 %2195, %v70_v16  }
  0x4b   :  { %341 = vmatpush1.bf16.msra.mxu0 %v2206_v18  ;;  %v2720_v18 = vld [vmem:[#allocation3 + $0x30] ss:$8 sps:$4 sm:$0xff]  }
  0x4c   :  { %342 = vmatprep.subr.bf16.mxu0 %v2456_v1 }
  0x4d   :  { %2197 = vset.pattern.permute.xlu1 %v2455_v0  ;;  %v2696_v0 = vld [vmem:[#allocation3 + $0x4] ss:$8 sps:$4 sm:$0xff]  }
  0x4e   :  { %133 = vperm.xlu1 %2197, %v70_v16   ;;  %590 = vmatprep.subr.bf16.mxu1 %v2696_v0 }
  0x4f   :  { %343 = vmatpush1.bf16.msra.mxu0 %v2207_v19 }
  0x50   :  { %344 = vmatprep.subr.bf16.mxu0 %v2456_v1 }
  0x53   :  { %345 = vmatpush1.bf16.msra.mxu0 %v2208_v20 }
  0x54   :  { %346 = vmatprep.subr.bf16.mxu0 %v2456_v1 }
  0x57   :  { %347 = vmatpush1.bf16.msra.mxu0 %v2209_v22 }
  0x58   :  { %348 = vmatprep.subr.bf16.mxu0 %v2456_v1 }
  0x5b   :  { %349 = vmatpush1.bf16.msra.mxu0 %v2210_v26 }
  0x5c   :  { %466 = vmatprep.subr.bf16.mxu0 %v2213_v21 }
  0xa7   :  { %v113_v32 = vpop.permute.xlu1 %112  ;;  %v73_v33 = vpop.permute.xlu0 %72 }
  0xa8   :  { %vm136_vm0 = vcmp.eq.s32.totalorder %v2639_v31, %v113_v32  ;;  %vm96_vm1 = vcmp.eq.s32.totalorder %v2639_v31, %v73_v33  ;;  %vm135_vm7 = vcmp.eq.s32.totalorder %v2636_v30, %v113_v32  ;;  %vm95_vm8 = vcmp.eq.s32.totalorder %v2636_v30, %v73_v33  ;;  %v401_v32 = vld [vmem:[#allocation5] sm:$0x3] }
  0xa9   :  { %vm152_vm2 = vmor %vm96_vm1, %vm136_vm0 }
  0xaa   :  { %v1981_v37 = vsel %vm152_vm2, 1.0, %v2457_v36  ;;  %vm151_vm12 = vmor %vm95_vm8, %vm135_vm7 }
  0xab   :  { %v116_v34 = vpop.permute.xlu1 %115  ;;  %v76_v35 = vpop.permute.xlu0 %75 }
  0xac   :  { %vm137_vm3 = vcmp.eq.s32.totalorder %v2636_v30, %v116_v34  ;;  %vm138_vm4 = vcmp.eq.s32.totalorder %v2639_v31, %v116_v34  ;;  %vm97_vm5 = vcmp.eq.s32.totalorder %v2636_v30, %v76_v35  ;;  %vm98_vm6 = vcmp.eq.s32.totalorder %v2639_v31, %v76_v35 }
  0xad   :  { %vm154_vm9 = vmor %vm98_vm6, %vm138_vm4 }
  0xae   :  { %vm153_vm10 = vmor %vm97_vm5, %vm137_vm3  ;;  %v1983_v38 = vsel %vm154_vm9, 1.0, %v2457_v36 }
  0xaf   :  { %v200_v40 = vpack.c.bf16 %v1983_v38, %v1981_v37  ;;  %vm2010_vm13 = vmpackc.low %vm153_vm10, %vm151_vm12 }
  0xb0   :  { %v82_v39 = vpop.permute.xlu1 %81  ;;  %v119_v41 = vpop.permute.xlu0 %118 }
  0xb1   :  { %2009 = vmatprep.mubr.msk.bf16.mxu0 %vm311_vm11, %v200_v40  ;;  %vm102_vm0 = vcmp.eq.s32.totalorder %v2639_v31, %v82_v39  ;;  %vm140_vm1 = vcmp.eq.s32.totalorder %v2639_v31, %v119_v41  ;;  %vm101_vm3 = vcmp.eq.s32.totalorder %v2636_v30, %v82_v39  ;;  %vm139_vm4 = vcmp.eq.s32.totalorder %v2636_v30, %v119_v41 }
  0xb2   :  { %2011 = vmatmul.mubr.msk.bf16.vlgmr.msra.gmra.mrb[0].mxu0 %vm2010_vm13, %v2458_v42 }
  0xb3   :  { %467 = vmatpush1.bf16.msra.mxu0 %v2211_v23 }
  0xb4   :  { %468 = vmatprep.subr.bf16.mxu0 %v2216_v24 }
  0xb5   :  { %v122_v43 = vpop.permute.xlu1 %121  ;;  %v79_v44 = vpop.permute.xlu0 %78 }
  0xb6   :  { %vm141_vm14 = vcmp.eq.s32.totalorder %v2636_v30, %v122_v43  ;;  %vm142_vm15 = vcmp.eq.s32.totalorder %v2639_v31, %v122_v43  ;;  %vm100_vm2 = vcmp.eq.s32.totalorder %v2639_v31, %v79_v44  ;;  %vm99_vm6 = vcmp.eq.s32.totalorder %v2636_v30, %v79_v44 }
  0xb7   :  { %vm158_vm5 = vmor %vm102_vm0, %vm142_vm15  ;;  %469 = vmatpush1.bf16.msra.mxu0 %v2214_v25 }
  0xb8   :  { %vm157_vm7 = vmor %vm101_vm3, %vm141_vm14  ;;  %v1987_v45 = vsel %vm158_vm5, 1.0, %v2457_v36  ;;  %470 = vmatprep.subr.bf16.mxu0 %v2219_v27 }
  0xb9   :  { %vm156_vm8 = vmor %vm100_vm2, %vm140_vm1  ;;  %v88_v49 = vpop.permute.xlu0 %87 }
  0xba   :  { %v85_v46 = vpop.permute.xlu1 %84  ;;  %vm155_vm9 = vmor %vm99_vm6, %vm139_vm4  ;;  %v1985_v47 = vsel %vm156_vm8, 1.0, %v2457_v36  ;;  %vm106_vm1 = vcmp.eq.s32.totalorder %v2639_v31, %v88_v49  ;;  %vm105_vm2 = vcmp.eq.s32.totalorder %v2636_v30, %v88_v49 }
  0xbb   :  { %v202_v48 = vpack.c.bf16 %v1987_v45, %v1985_v47  ;;  %471 = vmatpush1.bf16.msra.mxu0 %v2217_v28  ;;  %vm2013_vm10 = vmpackc.low %vm157_vm7, %vm155_vm9  ;;  %vm104_vm13 = vcmp.eq.s32.totalorder %v2639_v31, %v85_v46  ;;  %vm103_vm6 = vcmp.eq.s32.totalorder %v2636_v30, %v85_v46 }
  0xbc   :  { %472 = vmatprep.subr.bf16.mxu0 %v2222_v63 }
  0xbd   :  { %2012 = vmatprep.mubr.msk.bf16.mxu0 %vm311_vm11, %v202_v48  ;;  %v91_v51 = vpop.permute.xlu0 %90 }
  0xbe   :  { %2014 = vmatmul.mubr.msk.bf16.gmra.mrb[4].mxu0 %vm2013_vm10, %v2458_v42  ;;  %vm108_vm10 = vcmp.eq.s32.totalorder %v2639_v31, %v91_v51 }
  0xbf   :  { %v125_v50 = vpop.permute.xlu1 %124  ;;  %473 = vmatpush1.bf16.msra.mxu0 %v2220_v62 }
  0xc0   :  { %vm144_vm12 = vcmp.eq.s32.totalorder %v2639_v31, %v125_v50  ;;  %vm143_vm3 = vcmp.eq.s32.totalorder %v2636_v30, %v125_v50  ;;  %806 = vmatprep.subr.bf16.mxu0 %v2696_v0 }
  0xc1   :  { %vm160_vm15 = vmor %vm104_vm13, %vm144_vm12 }
  0xc2   :  { %v1989_v53 = vsel %vm160_vm15, 1.0, %v2457_v36  ;;  %v131_v54 = vpop.permute.xlu0 %130  ;;  %vm159_vm7 = vmor %vm103_vm6, %vm143_vm3 }
  0xc3   :  { %v128_v52 = vpop.permute.xlu1 %127  ;;  %vm148_vm8 = vcmp.eq.s32.totalorder %v2639_v31, %v131_v54 }
  0xc4   :  { %vm146_vm14 = vcmp.eq.s32.totalorder %v2639_v31, %v128_v52  ;;  %vm145_vm0 = vcmp.eq.s32.totalorder %v2636_v30, %v128_v52  ;;  %vm164_vm12 = vmor %vm108_vm10, %vm148_vm8  ;;  %vm1398_vm8 = vcmask 130048   ;;  %vm2460_vm10 = vmmov 0  }
  0xc5   :  { %vm162_vm4 = vmor %vm106_vm1, %vm146_vm14  ;;  %v1993_v59 = vsel %vm164_vm12, 1.0, %v2457_v36  ;;  %vm1816_vm12 = vcmask 818176  }
  0xc6   :  { %vm161_vm5 = vmor %vm105_vm2, %vm145_vm0  ;;  %v1991_v55 = vsel %vm162_vm4, 1.0, %v2457_v36  ;;  %vm147_vm0 = vcmp.eq.s32.totalorder %v2636_v30, %v131_v54  ;;  %vm107_vm4 = vcmp.eq.s32.totalorder %v2636_v30, %v91_v51 }
  0xc7   :  { %v204_v57 = vpack.c.bf16 %v1991_v55, %v1989_v53  ;;  %vm2016_vm9 = vmpackc.low %vm161_vm5, %vm159_vm7 }
  0xc8   :  { %v94_v56 = vpop.permute.xlu1 %93  ;;  %vm163_vm5 = vmor %vm107_vm4, %vm147_vm0 }
  0xc9   :  { %2015 = vmatprep.mubr.msk.bf16.mxu0 %vm311_vm11, %v204_v57  ;;  %vm110_vm15 = vcmp.eq.s32.totalorder %v2639_v31, %v94_v56  ;;  %vm109_vm1 = vcmp.eq.s32.totalorder %v2636_v30, %v94_v56 }
  0xca   :  { %2017 = vmatmul.mubr.msk.bf16.gmra.mrb[8].mxu0 %vm2016_vm9, %v2458_v42  ;;  %vm1917_vm9 = vcmask 1041408  }
  0xcd   :  { %v134_v58 = vpop.permute.xlu1 %133 }
  0xce   :  { %vm149_vm13 = vcmp.eq.s32.totalorder %v2636_v30, %v134_v58  ;;  %vm150_vm14 = vcmp.eq.s32.totalorder %v2639_v31, %v134_v58  ;;  %v2749_v30 = vshrl.u32 %v60_v29, 7 }
  0xcf   :  { %vm166_vm2 = vmor %vm110_vm15, %vm150_vm14 }
  0xd0   :  { %vm165_vm3 = vmor %vm109_vm1, %vm149_vm13  ;;  %v1995_v60 = vsel %vm166_vm2, 1.0, %v2457_v36  ;;  %v2752_v31 = vsub.s32 0, %v2749_v30  ;;  %v2755_v33 = vsub.s32 1, %v2749_v30  ;;  %vm1961_vm13 = vcmask 23552  }
  0xd1   :  { %v206_v61 = vpack.c.bf16 %v1995_v60, %v1993_v59  ;;  %vm2019_vm6 = vmpackc.low %vm165_vm3, %vm163_vm5 }
  0xd2   :  { %v406_v35 = vrot.slane %v401_v32, %v2752_v31  ;;  %v410_v38 = vrot.slane %v401_v32, %v2755_v33 }
  0xd3   :  { %2018 = vmatprep.mubr.msk.bf16.mxu0 %vm311_vm11, %v206_v61  ;;  %vm453_vm11 = vcmask 523264  }
  0xd4   :  { %2020 = vmatmul.mubr.msk.bf16.gmra.mrb[12].mxu0 %vm2019_vm6, %v2458_v42 }
  0xd5   :  { %498 = vmatprep.mubr.bf16.mxu0 %v2456_v1 }
 0x185   :  { %v358_v2 = vpop.f32.mrb[0].mxu0 }
 0x186   :  { %v360_v3 = vpop.f32.mrb[1].mxu0 }
 0x187   :  { %v361_v4 = vpop.f32.mrb[2].mxu0 }
 0x188   :  { %v389_v5 = vpack.c.bf16 %v361_v4, %v358_v2  ;;  %v363_v6 = vpop.f32.mrb[3].mxu0 }
 0x18a   :  { %2029 = vmatmul.mubr.msk.bf16.vlgmr.msra.gmra.mrb[16].mxu0 %vm453_vm11, %v389_v5 }
 0x18b   :  { %508 = vmatprep.mubr.bf16.mxu0 %v2456_v1  ;;  %807 = vmatpush1.bf16.msra.mxu0 %v2700_v7 }
 0x18c   :  { %808 = vmatprep.subr.bf16.mxu0 %v2703_v8 }
 0x18f   :  { %809 = vmatpush1.bf16.msra.mxu0 %v2708_v9 }
 0x190   :  { %810 = vmatprep.subr.bf16.mxu0 %v2710_v10 }
 0x191   :  { %v366_v11 = vpop.f32.mrb[4].mxu0 }
 0x192   :  { %v368_v13 = vpop.f32.mrb[5].mxu0 }
 0x193   :  { %v369_v15 = vpop.f32.mrb[6].mxu0  ;;  %811 = vmatpush1.bf16.msra.mxu0 %v2714_v12 }
 0x194   :  { %v390_v16 = vpack.c.bf16 %v369_v15, %v366_v11  ;;  %v371_v17 = vpop.f32.mrb[7].mxu0  ;;  %812 = vmatprep.subr.bf16.mxu0 %v2716_v14 }
 0x196   :  { %2030 = vmatmul.mubr.msk.bf16.gmra.mrb[20].mxu0 %vm453_vm11, %v390_v16 }
 0x197   :  { %813 = vmatpush1.bf16.msra.mxu0 %v2720_v18  ;;  %838 = vmatprep.mubr.bf16.mxu0 %v2456_v1 }
 0x198   :  { %950 = vmatprep.subr.bf16.mxu0 %v2696_v0 }
 0x19d   :  { %v374_v19 = vpop.f32.mrb[8].mxu0 }
 0x19e   :  { %v376_v20 = vpop.f32.mrb[9].mxu0 }
 0x19f   :  { %v377_v21 = vpop.f32.mrb[10].mxu0 }
 0x1a0   :  { %v391_v22 = vpack.c.bf16 %v377_v21, %v374_v19  ;;  %v379_v23 = vpop.f32.mrb[11].mxu0 }
 0x1a2   :  { %2031 = vmatmul.mubr.msk.bf16.vlgmr.msra.gmra.mrb[0].mxu1 %vm453_vm11, %v391_v22 }
 0x1a3   :  { %591 = vmatpush1.bf16.msra.mxu1 %v2700_v7  ;;  %528 = vmatprep.mubr.bf16.mxu1 %v2456_v1 }
 0x1a4   :  { %592 = vmatprep.subr.bf16.mxu1 %v2703_v8 }
 0x1a7   :  { %v382_v24 = vpop.f32.mrb[12].mxu0  ;;  %593 = vmatpush1.bf16.msra.mxu1 %v2708_v9 }
 0x1a8   :  { %v384_v25 = vpop.f32.mrb[13].mxu0  ;;  %594 = vmatprep.subr.bf16.mxu1 %v2710_v10 }
 0x1a9   :  { %v385_v26 = vpop.f32.mrb[14].mxu0 }
 0x1aa   :  { %v392_v27 = vpack.c.bf16 %v385_v26, %v382_v24  ;;  %v387_v28 = vpop.f32.mrb[15].mxu0 }
 0x1ab   :  { %595 = vmatpush1.bf16.msra.mxu1 %v2714_v12 }
 0x1ac   :  { %2032 = vmatmul.mubr.msk.bf16.gmra.mrb[4].mxu1 %vm453_vm11, %v392_v27  ;;  %596 = vmatprep.subr.bf16.mxu1 %v2716_v14 }
 0x1ad   :  { %622 = vmatprep.mubr.bf16.mxu1 %v2456_v1 }
 0x1af   :  { %597 = vmatpush1.bf16.msra.mxu1 %v2720_v18 }
 0x1b0   :  { %662 = vmatprep.subr.bf16.mxu1 %v2696_v0 }
 0x1b4   :  { %623 = vmatmul.mubr.bf16.vlgmr.msra.gmra.mrb[8].mxu1 %v2456_v1 }
 0x1b5   :  { %663 = vmatpush1.bf16.msra.mxu1 %v2700_v7  ;;  %694 = vmatprep.mubr.bf16.mxu1 %v2456_v1 }
 0x1b6   :  { %664 = vmatprep.subr.bf16.mxu1 %v2703_v8 }
 0x1b9   :  { %665 = vmatpush1.bf16.msra.mxu1 %v2708_v9 }
 0x1ba   :  { %666 = vmatprep.subr.bf16.mxu1 %v2710_v10 }
 0x1bd   :  { %667 = vmatpush1.bf16.msra.mxu1 %v2714_v12 }
 0x1be   :  { %668 = vmatprep.subr.bf16.mxu1 %v2716_v14 }
 0x1c1   :  { %669 = vmatpush1.bf16.msra.mxu1 %v2720_v18 }
 0x1c2   :  { %734 = vmatprep.subr.bf16.mxu1 %v2696_v0 }
 0x25d   :  { %v500_v34 = vpop.f32.mrb[16].mxu0 }
 0x25e   :  { %v502_v37 = vpop.f32.mrb[17].mxu0  ;;  %v501_v4 = vadd.f32 %v500_v34, %v406_v35 }
 0x25f   :  { %v504_v39 = vpop.f32.mrb[18].mxu0  ;;  %v503_v5 = vadd.f32 %v502_v37, %v410_v38 }
 0x260   :  { %v2759_v40 = vadd.f32 %v504_v39, %v406_v35  ;;  %v506_v41 = vpop.f32.mrb[19].mxu0 }
 0x261   :  { %v2761_v42 = vadd.f32 %v506_v41, %v410_v38 }
 0x269   :  { %v510_v29 = vpop.f32.mrb[20].mxu0 }
 0x26a   :  { %v2763_v43 = vadd.f32 %v510_v29, %v406_v35  ;;  %v512_v44 = vpop.f32.mrb[21].mxu0 }
 0x26b   :  { %v2765_v45 = vadd.f32 %v512_v44, %v410_v38  ;;  %v514_v46 = vpop.f32.mrb[22].mxu0 }
 0x26c   :  { %v2767_v47 = vadd.f32 %v514_v46, %v406_v35  ;;  %v516_v48 = vpop.f32.mrb[23].mxu0 }
 0x26d   :  { %v2769_v49 = vadd.f32 %v516_v48, %v410_v38 }
 0x275   :  { %v520_v50 = vpop.f32.mrb[0].mxu1 }
 0x276   :  { %v2771_v51 = vadd.f32 %v520_v50, %v406_v35  ;;  %v522_v52 = vpop.f32.mrb[1].mxu1 }
 0x277   :  { %v2773_v53 = vadd.f32 %v522_v52, %v410_v38  ;;  %v524_v54 = vpop.f32.mrb[2].mxu1 }
 0x278   :  { %v2775_v55 = vadd.f32 %v524_v54, %v406_v35  ;;  %v526_v56 = vpop.f32.mrb[3].mxu1 }
 0x279   :  { %v2777_v57 = vadd.f32 %v526_v56, %v410_v38 }
 0x27f   :  { %v530_v58 = vpop.f32.mrb[4].mxu1 }
 0x280   :  { %v2779_v59 = vadd.f32 %v530_v58, %v406_v35  ;;  %v532_v60 = vpop.f32.mrb[5].mxu1 }
 0x281   :  { %v2781_v61 = vadd.f32 %v532_v60, %v410_v38  ;;  %v534_v62 = vpop.f32.mrb[6].mxu1 }
 0x282   :  { %v2783_v63 = vadd.f32 %v534_v62, %v406_v35  ;;  %v536_v2 = vpop.f32.mrb[7].mxu1 }
 0x283   :  { %v2785_v3 = vadd.f32 %v536_v2, %v410_v38 }
 0x287   :  { %v624_v6 = vpop.f32.mrb[8].mxu1 }
 0x288   :  { %v631_v11 = vadd.f32 %v624_v6, %v501_v4  ;;  %v626_v13 = vpop.f32.mrb[9].mxu1 }
 0x289   :  { %v632_v15 = vadd.f32 %v626_v13, %v503_v5  ;;  %v628_v16 = vpop.f32.mrb[10].mxu1 }
 0x28a   :  { %v2041_v17 = vmul.f32 -1.442695, %v631_v11  ;;  %v629_v19 = vpop.f32.mrb[11].mxu1 }
 0x28b   :  { %v2042_v25 = vmul.f32 -1.442695, %v632_v15 }
 0x28c   :  { %2291 = vpow2.f32 %v2041_v17 }
 0x28d   :  { %2293 = vtanh.f32 %v632_v15 }
 0x296   :  { %v2292_v20 = vpop.eup %2291 }
 0x297   :  { %v639_v21 = vadd.f32 1.0, %v2292_v20  ;;  %v2294_v22 = vpop.eup %2293 }
 0x299   :  { %2295 = vrcp.f32 %v639_v21 }
 0x29a   :  { %2297 = vpow2.f32 %v2042_v25 }
 0x2a3   :  { %v2296_v23 = vpop.eup %2295 }
 0x2a4   :  { %v647_v24 = vmul.f32 %v2296_v23, %v2294_v22  ;;  %v2298_v26 = vpop.eup %2297  ;;  %v646_v28 = vmul.f32 0.0, %v2296_v23 }
 0x2a5   :  { %v640_v27 = vadd.f32 1.0, %v2298_v26 }
 0x2a6   :  { %649 = vrot.lane.b32.xlu1 %v647_v24, %s2459_s3 }
 0x2a7   :  { %2299 = vrcp.f32 %v640_v27 }
 0x2b1   :  { %v2300_v35 = vpop.eup %2299 }
 0x318   :  { %v650_v32 = vpop.permute.xlu1 %649 }
 0x319   :  { %v652_v34 = vadd.f32 %v650_v32, %v646_v28 }
 0x31b   :  { %2301 = vtanh.f32 %v652_v34 }
 0x325   :  { %v2302_v37 = vpop.eup %2301 }
 0x326   :  { %v654_v38 = vmul.f32 %v2302_v37, %v2300_v35 }
 0x328   :  { %v655_v39 = vpack.c.bf16 %v654_v38, %v654_v38 }
 0x32a   :  { %657 = vrot.lane.b32.xlu0 %v655_v39, %s2459_s3 }
 0x39c   :  { %v658_v41 = vpop.permute.xlu0 %657 }
 0x39d   :  { %2043 = vmatmul.mubr.msk.bf16.vlgmr.msra.gmra.mrb[12].mxu1 %vm453_vm11, %v658_v41 }
 0x39e   :  { %735 = vmatpush1.bf16.msra.mxu1 %v2700_v7  ;;  %766 = vmatprep.mubr.bf16.mxu1 %v2456_v1 }
 0x39f   :  { %736 = vmatprep.subr.bf16.mxu1 %v2703_v8 }
 0x3a2   :  { %737 = vmatpush1.bf16.msra.mxu1 %v2708_v9 }
 0x3a3   :  { %738 = vmatprep.subr.bf16.mxu1 %v2710_v10 }
 0x3a6   :  { %739 = vmatpush1.bf16.msra.mxu1 %v2714_v12 }
 0x3a7   :  { %740 = vmatprep.subr.bf16.mxu1 %v2716_v14 }
 0x3aa   :  { %741 = vmatpush1.bf16.msra.mxu1 %v2720_v18 }
 0x3ab   :  { %878 = vmatprep.subr.bf16.mxu1 %v2696_v0 }
 0x470   :  { %v696_v29 = vpop.f32.mrb[12].mxu1 }
 0x471   :  { %v703_v44 = vadd.f32 %v696_v29, %v2759_v40  ;;  %v698_v46 = vpop.f32.mrb[13].mxu1 }
 0x472   :  { %v704_v48 = vadd.f32 %v698_v46, %v2761_v42  ;;  %v700_v50 = vpop.f32.mrb[14].mxu1 }
 0x473   :  { %v2044_v52 = vmul.f32 -1.442695, %v703_v44  ;;  %v701_v54 = vpop.f32.mrb[15].mxu1 }
 0x474   :  { %v2045_v4 = vmul.f32 -1.442695, %v704_v48 }
 0x475   :  { %2303 = vpow2.f32 %v2044_v52 }
 0x476   :  { %2305 = vtanh.f32 %v704_v48 }
 0x47f   :  { %v2304_v56 = vpop.eup %2303 }
 0x480   :  { %v711_v58 = vadd.f32 1.0, %v2304_v56  ;;  %v2306_v60 = vpop.eup %2305 }
 0x482   :  { %2307 = vrcp.f32 %v711_v58 }
 0x483   :  { %2309 = vpow2.f32 %v2045_v4 }
 0x48c   :  { %v2308_v62 = vpop.eup %2307 }
 0x48d   :  { %v719_v2 = vmul.f32 %v2308_v62, %v2306_v60  ;;  %v2310_v5 = vpop.eup %2309  ;;  %v718_v6 = vmul.f32 %v2308_v62, %v652_v34 }
 0x48e   :  { %v712_v40 = vadd.f32 1.0, %v2310_v5 }
 0x48f   :  { %721 = vrot.lane.b32.xlu1 %v719_v2, %s2459_s3 }
 0x490   :  { %2311 = vrcp.f32 %v712_v40 }
 0x49a   :  { %v2312_v13 = vpop.eup %2311 }
 0x501   :  { %v722_v11 = vpop.permute.xlu1 %721 }
 0x502   :  { %v724_v42 = vadd.f32 %v722_v11, %v718_v6 }
 0x504   :  { %2313 = vtanh.f32 %v724_v42 }
 0x50e   :  { %v2314_v15 = vpop.eup %2313 }
 0x50f   :  { %v726_v16 = vmul.f32 %v2314_v15, %v2312_v13 }
 0x511   :  { %v727_v17 = vpack.c.bf16 %v726_v16, %v726_v16 }
 0x513   :  { %729 = vrot.lane.b32.xlu0 %v727_v17, %s2459_s3 }
 0x585   :  { %v730_v19 = vpop.permute.xlu0 %729 }
 0x586   :  { %2046 = vmatmul.mubr.msk.bf16.vlgmr.msra.gmra.mrb[16].mxu1 %vm453_vm11, %v730_v19 }
 0x587   :  { %879 = vmatpush1.bf16.msra.mxu1 %v2700_v7  ;;  %910 = vmatprep.mubr.bf16.mxu1 %v2456_v1 }
 0x588   :  { %880 = vmatprep.subr.bf16.mxu1 %v2703_v8 }
 0x58b   :  { %881 = vmatpush1.bf16.msra.mxu1 %v2708_v9 }
 0x58c   :  { %882 = vmatprep.subr.bf16.mxu1 %v2710_v10 }
 0x58f   :  { %883 = vmatpush1.bf16.msra.mxu1 %v2714_v12 }
 0x590   :  { %884 = vmatprep.subr.bf16.mxu1 %v2716_v14 }
 0x593   :  { %885 = vmatpush1.bf16.msra.mxu1 %v2720_v18 }
 0x594   :  { %1022 = vmatprep.subr.bf16.mxu1 %v2696_v0 }
 0x659   :  { %v768_v20 = vpop.f32.mrb[16].mxu1 }
 0x65a   :  { %v775_v21 = vadd.f32 %v768_v20, %v2763_v43  ;;  %v770_v22 = vpop.f32.mrb[17].mxu1 }
 0x65b   :  { %v776_v23 = vadd.f32 %v770_v22, %v2765_v45  ;;  %v772_v24 = vpop.f32.mrb[18].mxu1 }
 0x65c   :  { %v2047_v25 = vmul.f32 -1.442695, %v775_v21  ;;  %v773_v26 = vpop.f32.mrb[19].mxu1 }
 0x65d   :  { %v2048_v37 = vmul.f32 -1.442695, %v776_v23 }
 0x65e   :  { %2315 = vpow2.f32 %v2047_v25 }
 0x65f   :  { %2317 = vtanh.f32 %v776_v23 }
 0x668   :  { %v2316_v27 = vpop.eup %2315 }
 0x669   :  { %v783_v28 = vadd.f32 1.0, %v2316_v27  ;;  %v2318_v32 = vpop.eup %2317 }
 0x66b   :  { %2319 = vrcp.f32 %v783_v28 }
 0x66c   :  { %2321 = vpow2.f32 %v2048_v37 }
 0x675   :  { %v2320_v34 = vpop.eup %2319 }
 0x676   :  { %v791_v35 = vmul.f32 %v2320_v34, %v2318_v32  ;;  %v2322_v38 = vpop.eup %2321  ;;  %v790_v39 = vmul.f32 %v2320_v34, %v724_v42 }
 0x677   :  { %v784_v43 = vadd.f32 1.0, %v2322_v38 }
 0x678   :  { %793 = vrot.lane.b32.xlu1 %v791_v35, %s2459_s3 }
 0x679   :  { %2323 = vrcp.f32 %v784_v43 }
 0x683   :  { %v2324_v29 = vpop.eup %2323 }
 0x6ea   :  { %v794_v41 = vpop.permute.xlu1 %793 }
 0x6eb   :  { %v796_v45 = vadd.f32 %v794_v41, %v790_v39 }
 0x6ed   :  { %2325 = vtanh.f32 %v796_v45 }
 0x6f7   :  { %v2326_v44 = vpop.eup %2325 }
 0x6f8   :  { %v798_v46 = vmul.f32 %v2326_v44, %v2324_v29 }
 0x6fa   :  { %v799_v48 = vpack.c.bf16 %v798_v46, %v798_v46 }
 0x6fc   :  { %801 = vrot.lane.b32.xlu0 %v799_v48, %s2459_s3 }
 0x76e   :  { %v802_v50 = vpop.permute.xlu0 %801 }
 0x76f   :  { %2049 = vmatmul.mubr.msk.bf16.vlgmr.msra.gmra.mrb[24].mxu0 %vm453_vm11, %v802_v50 }
 0x770   :  { %951 = vmatpush1.bf16.msra.mxu0 %v2700_v7  ;;  %982 = vmatprep.mubr.bf16.mxu0 %v2456_v1 }
 0x771   :  { %952 = vmatprep.subr.bf16.mxu0 %v2703_v8 }
 0x774   :  { %953 = vmatpush1.bf16.msra.mxu0 %v2708_v9 }
 0x775   :  { %954 = vmatprep.subr.bf16.mxu0 %v2710_v10 }
 0x778   :  { %955 = vmatpush1.bf16.msra.mxu0 %v2714_v12 }
 0x779   :  { %956 = vmatprep.subr.bf16.mxu0 %v2716_v14 }
 0x77c   :  { %957 = vmatpush1.bf16.msra.mxu0 %v2720_v18 }
 0x77d   :  { %1094 = vmatprep.subr.bf16.mxu0 %v2696_v0 }
 0x842   :  { %v840_v52 = vpop.f32.mrb[24].mxu0 }
 0x843   :  { %v847_v54 = vadd.f32 %v840_v52, %v2767_v47  ;;  %v842_v56 = vpop.f32.mrb[25].mxu0 }
 0x844   :  { %v848_v58 = vadd.f32 %v842_v56, %v2769_v49  ;;  %v844_v60 = vpop.f32.mrb[26].mxu0 }
 0x845   :  { %v2050_v62 = vmul.f32 -1.442695, %v847_v54  ;;  %v845_v2 = vpop.f32.mrb[27].mxu0 }
 0x846   :  { %v2051_v0 = vmul.f32 -1.442695, %v848_v58 }
 0x847   :  { %2327 = vpow2.f32 %v2050_v62 }
 0x848   :  { %2329 = vtanh.f32 %v848_v58 }
 0x851   :  { %v2328_v4 = vpop.eup %2327 }
 0x852   :  { %v855_v5 = vadd.f32 1.0, %v2328_v4  ;;  %v2330_v40 = vpop.eup %2329 }
 0x854   :  { %2331 = vrcp.f32 %v855_v5 }
 0x855   :  { %2333 = vpow2.f32 %v2051_v0 }
 0x85e   :  { %v2332_v6 = vpop.eup %2331 }
 0x85f   :  { %v863_v11 = vmul.f32 %v2332_v6, %v2330_v40  ;;  %v2334_v42 = vpop.eup %2333  ;;  %v862_v13 = vmul.f32 %v2332_v6, %v796_v45 }
 0x860   :  { %v856_v47 = vadd.f32 1.0, %v2334_v42 }
 0x861   :  { %865 = vrot.lane.b32.xlu1 %v863_v11, %s2459_s3 }
 0x862   :  { %2335 = vrcp.f32 %v856_v47 }
 0x86c   :  { %v2336_v16 = vpop.eup %2335 }
 0x8d3   :  { %v866_v15 = vpop.permute.xlu1 %865 }
 0x8d4   :  { %v868_v49 = vadd.f32 %v866_v15, %v862_v13 }
 0x8d6   :  { %2337 = vtanh.f32 %v868_v49 }
 0x8e0   :  { %v2338_v17 = vpop.eup %2337 }
 0x8e1   :  { %v870_v19 = vmul.f32 %v2338_v17, %v2336_v16 }
 0x8e3   :  { %v871_v20 = vpack.c.bf16 %v870_v19, %v870_v19 }
 0x8e5   :  { %873 = vrot.lane.b32.xlu0 %v871_v20, %s2459_s3 }
 0x957   :  { %v874_v21 = vpop.permute.xlu0 %873 }
 0x958   :  { %2052 = vmatmul.mubr.msk.bf16.vlgmr.msra.gmra.mrb[20].mxu1 %vm453_vm11, %v874_v21 }
 0x959   :  { %1023 = vmatpush1.bf16.msra.mxu1 %v2700_v7  ;;  %1054 = vmatprep.mubr.bf16.mxu1 %v2456_v1 }
 0x95a   :  { %1024 = vmatprep.subr.bf16.mxu1 %v2703_v8 }
 0x95d   :  { %1025 = vmatpush1.bf16.msra.mxu1 %v2708_v9 }
 0x95e   :  { %1026 = vmatprep.subr.bf16.mxu1 %v2710_v10 }
 0x961   :  { %1027 = vmatpush1.bf16.msra.mxu1 %v2714_v12 }
 0x962   :  { %1028 = vmatprep.subr.bf16.mxu1 %v2716_v14 }
 0x965   :  { %1029 = vmatpush1.bf16.msra.mxu1 %v2720_v18 }
 0xa2b   :  { %v912_v22 = vpop.f32.mrb[20].mxu1 }
 0xa2c   :  { %v919_v23 = vadd.f32 %v912_v22, %v2771_v51  ;;  %v914_v24 = vpop.f32.mrb[21].mxu1 }
 0xa2d   :  { %v920_v25 = vadd.f32 %v914_v24, %v2773_v53  ;;  %v916_v26 = vpop.f32.mrb[22].mxu1 }
 0xa2e   :  { %v2053_v27 = vmul.f32 -1.442695, %v919_v23  ;;  %v917_v28 = vpop.f32.mrb[23].mxu1 }
 0xa2f   :  { %v2054_v43 = vmul.f32 -1.442695, %v920_v25 }
 0xa30   :  { %2339 = vpow2.f32 %v2053_v27 }
 0xa31   :  { %2341 = vtanh.f32 %v920_v25 }
 0xa3a   :  { %v2340_v32 = vpop.eup %2339 }
 0xa3b   :  { %v927_v34 = vadd.f32 1.0, %v2340_v32  ;;  %v2342_v35 = vpop.eup %2341 }
 0xa3d   :  { %2343 = vrcp.f32 %v927_v34 }
 0xa3e   :  { %2345 = vpow2.f32 %v2054_v43 }
 0xa47   :  { %v2344_v37 = vpop.eup %2343 }
 0xa48   :  { %v935_v38 = vmul.f32 %v2344_v37, %v2342_v35  ;;  %v2346_v39 = vpop.eup %2345  ;;  %v934_v41 = vmul.f32 %v2344_v37, %v868_v49 }
 0xa49   :  { %v928_v51 = vadd.f32 1.0, %v2346_v39 }
 0xa4a   :  { %937 = vrot.lane.b32.xlu1 %v935_v38, %s2459_s3 }
 0xa4b   :  { %2347 = vrcp.f32 %v928_v51 }
 0xa55   :  { %v2348_v29 = vpop.eup %2347 }
 0xabc   :  { %v938_v45 = vpop.permute.xlu1 %937 }
 0xabd   :  { %v940_v53 = vadd.f32 %v938_v45, %v934_v41 }
 0xabf   :  { %2349 = vtanh.f32 %v940_v53 }
 0xac9   :  { %v2350_v44 = vpop.eup %2349 }
 0xaca   :  { %v942_v46 = vmul.f32 %v2350_v44, %v2348_v29 }
 0xacc   :  { %v943_v48 = vpack.c.bf16 %v942_v46, %v942_v46 }
 0xace   :  { %945 = vrot.lane.b32.xlu0 %v943_v48, %s2459_s3 }
 0xb40   :  { %v946_v50 = vpop.permute.xlu0 %945 }
 0xb41   :  { %2055 = vmatmul.mubr.msk.bf16.vlgmr.msra.gmra.mrb[28].mxu0 %vm453_vm11, %v946_v50 }
 0xb42   :  { %1095 = vmatpush1.bf16.msra.mxu0 %v2700_v7  ;;  %1126 = vmatprep.mubr.bf16.mxu0 %v2456_v1 }
 0xb43   :  { %1096 = vmatprep.subr.bf16.mxu0 %v2703_v8 }
 0xb46   :  { %1097 = vmatpush1.bf16.msra.mxu0 %v2708_v9 }
 0xb47   :  { %1098 = vmatprep.subr.bf16.mxu0 %v2710_v10 }
 0xb4a   :  { %1099 = vmatpush1.bf16.msra.mxu0 %v2714_v12 }
 0xb4b   :  { %1100 = vmatprep.subr.bf16.mxu0 %v2716_v14 }
 0xb4e   :  { %1101 = vmatpush1.bf16.msra.mxu0 %v2720_v18 }
 0xc14   :  { %v984_v52 = vpop.f32.mrb[28].mxu0 }
 0xc15   :  { %v991_v54 = vadd.f32 %v984_v52, %v2775_v55  ;;  %v986_v56 = vpop.f32.mrb[29].mxu0 }
 0xc16   :  { %v992_v7 = vadd.f32 %v986_v56, %v2777_v57  ;;  %v988_v58 = vpop.f32.mrb[30].mxu0  ;;  %v2240_v56 = vld [vmem:[%s3103_s5 + $0xc] ss:$16 sps:$4 sm:$0xff]  }
 0xc17   :  { %v2056_v60 = vmul.f32 -1.442695, %v991_v54  ;;  %v989_v62 = vpop.f32.mrb[31].mxu0  ;;  %v2238_v54 = vld [vmem:[%s3103_s5 + $0x8] ss:$16 sps:$4 sm:$0xff]   ;;  %1333 = vmatprep.subr.bf16.mxu0 %v2240_v56 }
 0xc18   :  { %v2057_v14 = vmul.f32 -1.442695, %v992_v7  ;;  %v2246_v58 = vld [vmem:[%s3103_s5 + $0x2c] ss:$16 sps:$4 sm:$0xff]   ;;  %v2244_v62 = vld [vmem:[%s3103_s5 + $0x28] ss:$16 sps:$4 sm:$0xff]  }
 0xc19   :  { %2351 = vpow2.f32 %v2056_v60  ;;  %v2241_v60 = vld [vmem:[%s3103_s5 + $0x20] ss:$16 sps:$4 sm:$0xff]  }
 0xc1a   :  { %2353 = vtanh.f32 %v992_v7  ;;  %v2243_v7 = vld [vmem:[%s3103_s5 + $0x24] ss:$16 sps:$4 sm:$0xff]  }
 0xc23   :  { %v2352_v8 = vpop.eup %2351 }
 0xc24   :  { %v999_v9 = vadd.f32 1.0, %v2352_v8  ;;  %v2354_v10 = vpop.eup %2353  ;;  %v2249_v8 = vld [vmem:[%s3103_s5 + $0x44] ss:$16 sps:$4 sm:$0xff]  }
 0xc26   :  { %2355 = vrcp.f32 %v999_v9  ;;  %v2252_v9 = vld [vmem:[%s3103_s5 + $0x4c] ss:$16 sps:$4 sm:$0xff]  }
 0xc27   :  { %2357 = vpow2.f32 %v2057_v14  ;;  %v2258_v14 = vld [vmem:[%s3103_s5 + $0x6c] ss:$16 sps:$4 sm:$0xff]  }
 0xc30   :  { %v2356_v12 = vpop.eup %2355 }
 0xc31   :  { %v1007_v2 = vmul.f32 %v2356_v12, %v2354_v10  ;;  %v2358_v18 = vpop.eup %2357  ;;  %v1006_v4 = vmul.f32 %v2356_v12, %v940_v53  ;;  %v2247_v10 = vld [vmem:[%s3103_s5 + $0x40] ss:$16 sps:$4 sm:$0xff]   ;;  %v2250_v12 = vld [vmem:[%s3103_s5 + $0x48] ss:$16 sps:$4 sm:$0xff]  }
 0xc32   :  { %v1000_v55 = vadd.f32 1.0, %v2358_v18  ;;  %v2253_v18 = vld [vmem:[%s3103_s5 + $0x60] ss:$16 sps:$4 sm:$0xff]  }
 0xc33   :  { %1009 = vrot.lane.b32.xlu1 %v1007_v2, %s2459_s3  ;;  %v2255_v2 = vld [vmem:[%s3103_s5 + $0x64] ss:$16 sps:$4 sm:$0xff]  }
 0xc34   :  { %2359 = vrcp.f32 %v1000_v55  ;;  %v2256_v55 = vld [vmem:[%s3103_s5 + $0x68] ss:$16 sps:$4 sm:$0xff]  }
 0xc3e   :  { %v2360_v40 = vpop.eup %2359 }
 0xca5   :  { %v1010_v5 = vpop.permute.xlu1 %1009 }
 0xca6   :  { %v1012_v57 = vadd.f32 %v1010_v5, %v1006_v4 }
 0xca8   :  { %2361 = vtanh.f32 %v1012_v57 }
 0xcb2   :  { %v2362_v6 = vpop.eup %2361 }
 0xcb3   :  { %v1014_v11 = vmul.f32 %v2362_v6, %v2360_v40 }
 0xcb5   :  { %v1015_v0 = vpack.c.bf16 %v1014_v11, %v1014_v11 }
 0xcb7   :  { %1017 = vrot.lane.b32.xlu0 %v1015_v0, %s2459_s3 }
 0xd29   :  { %v1018_v42 = vpop.permute.xlu0 %1017 }
 0xd2a   :  { %2058 = vmatmul.mubr.msk.bf16.vlgmr.msra.gmra.mrb[24].mxu1 %vm453_vm11, %v1018_v42 }
 0xd2b   :  { %1324 = vmatprep.mubr.bf16.mxu1 %v2456_v1 }
 0xdfd   :  { %v1056_v47 = vpop.f32.mrb[24].mxu1 }
 0xdfe   :  { %v1063_v13 = vadd.f32 %v1056_v47, %v2779_v59  ;;  %v1058_v15 = vpop.f32.mrb[25].mxu1 }
 0xdff   :  { %v1064_v49 = vadd.f32 %v1058_v15, %v2781_v61  ;;  %v1060_v16 = vpop.f32.mrb[26].mxu1 }
 0xe00   :  { %v2059_v17 = vmul.f32 -1.442695, %v1063_v13  ;;  %v1061_v19 = vpop.f32.mrb[27].mxu1  ;;  %v2260_v16 = vld [vmem:[%s3104_s6 + $0x40] sm:$0xff]  }
 0xe01   :  { %v2060_v25 = vmul.f32 -1.442695, %v1064_v49  ;;  %v2262_v19 = vld [vmem:[%s3104_s6 + $0x88] sm:$0xff]  }
 0xe02   :  { %2363 = vpow2.f32 %v2059_v17  ;;  %v2261_v17 = vld [vmem:[%s3104_s6] sm:$0xff]  }
 0xe03   :  { %2365 = vtanh.f32 %v1064_v49  ;;  %v2259_v49 = vld [vmem:[%s3104_s6 + $0x80] sm:$0xff]  }
 0xe0c   :  { %v2364_v20 = vpop.eup %2363 }
 0xe0d   :  { %v1071_v21 = vadd.f32 1.0, %v2364_v20  ;;  %v2366_v22 = vpop.eup %2365  ;;  %v2263_v20 = vld [vmem:[%s3104_s6 + $0x48] sm:$0xff]  }
 0xe0f   :  { %2367 = vrcp.f32 %v1071_v21  ;;  %v2264_v21 = vld [vmem:[%s3104_s6 + $0x8] sm:$0xff]  }
 0xe10   :  { %2369 = vpow2.f32 %v2060_v25  ;;  %v2268_v25 = vld [vmem:[%s3104_s6 + $0x98] sm:$0xff]  }
 0xe19   :  { %v2368_v23 = vpop.eup %2367 }
 0xe1a   :  { %v1079_v24 = vmul.f32 %v2368_v23, %v2366_v22  ;;  %v2370_v26 = vpop.eup %2369  ;;  %v1078_v27 = vmul.f32 %v2368_v23, %v1012_v57  ;;  %v2265_v22 = vld [vmem:[%s3104_s6 + $0x90] sm:$0xff]  }
 0xe1b   :  { %v1072_v59 = vadd.f32 1.0, %v2370_v26  ;;  %v2266_v23 = vld [vmem:[%s3104_s6 + $0x50] sm:$0xff]   ;;  %v2269_v26 = vld [vmem:[%s3104_s6 + $0x58] sm:$0xff]  }
 0xe1c   :  { %1081 = vrot.lane.b32.xlu1 %v1079_v24, %s2459_s3  ;;  %v2267_v24 = vld [vmem:[%s3104_s6 + $0x10] sm:$0xff]  }
 0xe1d   :  { %2371 = vrcp.f32 %v1072_v59  ;;  %v2270_v59 = vld [vmem:[%s3104_s6 + $0x18] sm:$0xff]  }
 0xe27   :  { %v2372_v32 = vpop.eup %2371 }
 0xe8e   :  { %v1082_v28 = vpop.permute.xlu1 %1081 }
 0xe8f   :  { %v2862_v61 = vadd.f32 %v1082_v28, %v1078_v27  ;;  %v2271_v27 = vld [vmem:[%s3104_s6 + $0xa0] sm:$0xff]  }
 0xe90   :  { %v2272_v28 = vld [vmem:[%s3104_s6 + $0x60] sm:$0xff]  }
 0xe91   :  { %2373 = vtanh.f32 %v2862_v61 }
 0xe9b   :  { %v2374_v34 = vpop.eup %2373 }
 0xe9c   :  { %v1086_v35 = vmul.f32 %v2374_v34, %v2372_v32  ;;  %v2274_v32 = vld [vmem:[%s3104_s6 + $0xa8] sm:$0xff]  }
 0xe9d   :  { %v2275_v34 = vld [vmem:[%s3104_s6 + $0x68] sm:$0xff]  }
 0xe9e   :  { %v1087_v37 = vpack.c.bf16 %v1086_v35, %v1086_v35  ;;  %v2276_v35 = vld [vmem:[%s3104_s6 + $0x28] sm:$0xff]  }
 0xea0   :  { %1089 = vrot.lane.b32.xlu0 %v1087_v37, %s2459_s3  ;;  %v2277_v37 = vld [vmem:[%s3104_s6 + $0xb0] sm:$0xff]  }
 0xf12   :  { %v1090_v38 = vpop.permute.xlu0 %1089 }
 0xf13   :  { %2061 = vmatmul.mubr.msk.bf16.vlgmr.msra.gmra.mrb[32].mxu0 %vm453_vm11, %v1090_v38  ;;  %v2278_v38 = vld [vmem:[%s3104_s6 + $0x70] sm:$0xff]  }
 0xf14   :  { %1365 = vmatprep.mubr.bf16.mxu0 %v2456_v1  ;;  %1334 = vmatpush1.bf16.msra.mxu0 %v2238_v54 }
 0xf15   :  { %1335 = vmatprep.subr.bf16.mxu0 %v2246_v58 }
 0xf18   :  { %1336 = vmatpush1.bf16.msra.mxu0 %v2244_v62 }
 0xf19   :  { %1337 = vmatprep.subr.bf16.mxu0 %v2252_v9 }
 0xf1c   :  { %1338 = vmatpush1.bf16.msra.mxu0 %v2250_v12 }
 0xf1d   :  { %1339 = vmatprep.subr.bf16.mxu0 %v2258_v14 }
 0xf20   :  { %1340 = vmatpush1.bf16.msra.mxu0 %v2256_v55 }
 0xf21   :  { %1773 = vmatprep.subr.bf16.mxu0 %v2456_v1 }
 0xfe6   :  { %v1128_v43 = vpop.f32.mrb[32].mxu0 }
 0xfe7   :  { %v1135_v39 = vadd.f32 %v1128_v43, %v2783_v63  ;;  %v1130_v51 = vpop.f32.mrb[33].mxu0  ;;  %v2235_v63 = vld [vmem:[%s3103_s5] ss:$16 sps:$4 sm:$0xff]  }
 0xfe8   :  { %v1136_v41 = vadd.f32 %v1130_v51, %v2785_v3  ;;  %v1132_v45 = vpop.f32.mrb[34].mxu0  ;;  %v2237_v3 = vld [vmem:[%s3103_s5 + $0x4] ss:$16 sps:$4 sm:$0xff]   ;;  %v2281_v51 = vld [vmem:[%s3104_s6 + $0x78] sm:$0xff]   ;;  %s1160_s5 = scvt.s32.f32 %s3098_s0 }
 0xfe9   :  { %v2062_v53 = vmul.f32 -1.442695, %v1135_v39  ;;  %v1133_v29 = vpop.f32.mrb[35].mxu0  ;;  %1292 = vmatprep.subr.bf16.mxu1 %v2237_v3  ;;  %v2279_v43 = vld [vmem:[%s3104_s6 + $0x30] sm:$0xff]   ;;  %v2280_v39 = vld [vmem:[%s3104_s6 + $0xb8] sm:$0xff]   ;;  %v2283_v45 = vld [vmem:[%s3104_s6 + $0xc0] sm:$0xff]  }
 0xfea   :  { %1293 = vmatpush1.bf16.msra.mxu1 %v2235_v63  ;;  %v2063_v4 = vmul.f32 -1.442695, %v1136_v41  ;;  %v1163_v29 = vstv %s3098_s0 }
 0xfeb   :  { %2375 = vpow2.f32 %v2062_v53  ;;  %1294 = vmatprep.subr.bf16.mxu1 %v2243_v7  ;;  %v3009_v53 = vsub.s32 2, %v2749_v30  ;;  %vm1164_vm7 = vcmp.lt.s32.totalorder %v2749_v30, %v1163_v29  ;;  %v1406_v7 = vstv %s1160_s5 }
 0xfec   :  { %2377 = vtanh.f32 %v1136_v41  ;;  %v2282_v41 = vld [vmem:[%s3104_s6 + $0x38] sm:$0xff]   ;;  %v3026_v63 = vsel %vm1164_vm7, 1.0, %v2457_v36 }
 0xfee   :  { %1295 = vmatpush1.bf16.msra.mxu1 %v2241_v60 }
 0xfef   :  { %1296 = vmatprep.subr.bf16.mxu1 %v2249_v8 }
 0xff2   :  { %1297 = vmatpush1.bf16.msra.mxu1 %v2247_v10 }
 0xff3   :  { %1298 = vmatprep.subr.bf16.mxu1 %v2255_v2 }
 0xff5   :  { %v2376_v44 = vpop.eup %2375 }
 0xff6   :  { %v1143_v46 = vadd.f32 1.0, %v2376_v44  ;;  %v2378_v48 = vpop.eup %2377  ;;  %1299 = vmatpush1.bf16.msra.mxu1 %v2253_v18  ;;  %v1184_v44 = vld [vmem:[#allocation5 + $0x2] sm:$0xf] }
 0xff7   :  { %2121 = vmatprep.subr.bf16.mxu1 %v2260_v16 }
 0xff8   :  { %2379 = vrcp.f32 %v1143_v46  ;;  %v3015_v46 = vsub.s32 3, %v2749_v30 }
 0xff9   :  { %2381 = vpow2.f32 %v2063_v4 }
0x1002   :  { %v2380_v50 = vpop.eup %2379 }
0x1003   :  { %v1151_v52 = vmul.f32 %v2380_v50, %v2378_v48  ;;  %v2382_v5 = vpop.eup %2381  ;;  %v1150_v40 = vmul.f32 %v2380_v50, %v2862_v61  ;;  %v2273_v61 = vld [vmem:[%s3104_s6 + $0x20] sm:$0xff]   ;;  %v1197_v48 = vrot.slane %v1184_v44, %v3009_v53  ;;  %v1193_v50 = vrot.slane %v1184_v44, %v2755_v33 }
0x1004   :  { %v1144_v57 = vadd.f32 1.0, %v2382_v5 }
0x1005   :  { %1153 = vrot.lane.b32.xlu1 %v1151_v52, %s2459_s3  ;;  %v1201_v52 = vrot.slane %v1184_v44, %v3015_v46 }
0x1006   :  { %2383 = vrcp.f32 %v1144_v57 }
0x1010   :  { %v2384_v0 = vpop.eup %2383 }
0x1077   :  { %v1154_v6 = vpop.permute.xlu1 %1153 }
0x1078   :  { %v1156_v11 = vadd.f32 %v1154_v6, %v1150_v40 }
0x107a   :  { %2385 = vtanh.f32 %v1156_v11 }
0x107b   :  { %2387 = vrcp.f32 %v1406_v7 }
0x1084   :  { %v2386_v42 = vpop.eup %2385 }
0x1085   :  { %v1158_v47 = vmul.f32 %v2386_v42, %v2384_v0 }
0x1087   :  { %v1167_v13 = vpack.c.bf16 %v1158_v47, %v1158_v47 }
0x1089   :  { %1207 = vrot.lane.b32.xlu0 %v1167_v13, %s2459_s3 }
0x10fb   :  { %v1208_v15 = vpop.permute.xlu0 %1207 }
0x10fc   :  { %2081 = vmatmul.mubr.msk.bf16.vlgmr.msra.gmra.mrb[28].mxu1 %vm453_vm11, %v1208_v15  ;;  %2082 = vmatmul.mubr.msk.bf16.vlgmr.msra.gmra.mrb[36].mxu0 %vm453_vm11, %v1208_v15 }
0x10fd   :  { %1774 = vmatpush1.bf16.msra.mxu0 %v2259_v49  ;;  %2122 = vmatpush3.bf16.msra.mxu1 %v2261_v17 }
0x10fe   :  { %1775 = vmatprep.subr.bf16.mxu0 %v2456_v1  ;;  %2123 = vmatprep.subr.bf16.mxu1 %v2263_v20 }
0x1101   :  { %1776 = vmatpush1.bf16.msra.mxu0 %v2262_v19  ;;  %2124 = vmatpush3.bf16.msra.mxu1 %v2264_v21 }
0x1102   :  { %1777 = vmatprep.subr.bf16.mxu0 %v2456_v1  ;;  %2125 = vmatprep.subr.bf16.mxu1 %v2266_v23 }
0x1105   :  { %1778 = vmatpush1.bf16.msra.mxu0 %v2265_v22  ;;  %2126 = vmatpush3.bf16.msra.mxu1 %v2267_v24 }
0x1106   :  { %1779 = vmatprep.subr.bf16.mxu0 %v2456_v1  ;;  %2127 = vmatprep.subr.bf16.mxu1 %v2269_v26 }
0x1109   :  { %1780 = vmatpush1.bf16.msra.mxu0 %v2268_v25  ;;  %2128 = vmatpush3.bf16.msra.mxu1 %v2270_v59  ;;  %v3033_v25 = vpop.eup %2387 }
0x110a   :  { %1781 = vmatprep.subr.bf16.mxu0 %v2456_v1  ;;  %2129 = vmatprep.subr.bf16.mxu1 %v2272_v28 }
0x110d   :  { %1782 = vmatpush1.bf16.msra.mxu0 %v2271_v27  ;;  %2130 = vmatpush3.bf16.msra.mxu1 %v2273_v61 }
0x110e   :  { %1783 = vmatprep.subr.bf16.mxu0 %v2456_v1  ;;  %2131 = vmatprep.subr.bf16.mxu1 %v2275_v34 }
0x1111   :  { %1784 = vmatpush1.bf16.msra.mxu0 %v2274_v32  ;;  %2132 = vmatpush3.bf16.msra.mxu1 %v2276_v35 }
0x1112   :  { %1785 = vmatprep.subr.bf16.mxu0 %v2456_v1  ;;  %2133 = vmatprep.subr.bf16.mxu1 %v2278_v38 }
0x1115   :  { %1786 = vmatpush1.bf16.msra.mxu0 %v2277_v37  ;;  %2134 = vmatpush3.bf16.msra.mxu1 %v2279_v43 }
0x1116   :  { %1787 = vmatprep.subr.bf16.mxu0 %v2456_v1  ;;  %2135 = vmatprep.subr.bf16.mxu1 %v2281_v51 }
0x1119   :  { %1788 = vmatpush1.bf16.msra.mxu0 %v2280_v39  ;;  %2136 = vmatpush3.bf16.msra.mxu1 %v2282_v41 }
0x111a   :  { %1789 = vmatprep.subr.bf16.mxu0 %v2456_v1  ;;  %2151 = vmatprep.subr.bf16.mxu1 %v2457_v36  ;;  %v1189_v1 = vrot.slane %v1184_v44, %v2752_v31 }
0x111d   :  { %1790 = vmatpush1.bf16.msra.mxu0 %v2283_v45 }
0x11cf   :  { %v1326_v3 = vpop.f32.mrb[28].mxu1  ;;  %v1367_v54 = vpop.f32.mrb[36].mxu0 }
0x11d0   :  { %v1327_v56 = vadd.f32 %v1326_v3, %v1189_v1  ;;  %v1368_v58 = vadd.f32 %v1367_v54, %v1197_v48  ;;  %v1328_v60 = vpop.f32.mrb[29].mxu1  ;;  %v1369_v62 = vpop.f32.mrb[37].mxu0 }
0x11d1   :  { %v1329_v8 = vadd.f32 %v1328_v60, %v1193_v50  ;;  %v1370_v30 = vadd.f32 %v1369_v62, %v1201_v52  ;;  %v1330_v9 = vpop.f32.mrb[30].mxu1  ;;  %v1371_v10 = vpop.f32.mrb[38].mxu0 }
0x11d2   :  { %v1376_v12 = vmul.f32 %v3026_v63, %v1327_v56  ;;  %v1378_v2 = vmul.f32 %v3026_v63, %v1368_v58  ;;  %v1331_v14 = vpop.f32.mrb[31].mxu1  ;;  %v1372_v18 = vpop.f32.mrb[39].mxu0 }
0x11d3   :  { %v1377_v55 = vmul.f32 %v3026_v63, %v1329_v8  ;;  %v1379_v4 = vmul.f32 %v3026_v63, %v1370_v30 }
0x11d4   :  { %v1380_v5 = vrot.slane %v1376_v12, 4  ;;  %v1392_v57 = vrot.slane %v1378_v2, 4 }
0x11d5   :  { %v1386_v40 = vrot.slane %v1377_v55, 4  ;;  %v1399_v6 = vsel %vm1398_vm8, %v1379_v4, 0.0 }
0x11d6   :  { %v1381_v11 = vadd.f32 %v1380_v5, %v1376_v12  ;;  %v1393_v0 = vadd.f32 %v1392_v57, %v1378_v2  ;;  %v1400_v42 = vrot.slane %v1399_v6, 4 }
0x11d7   :  { %v1387_v47 = vadd.f32 %v1386_v40, %v1377_v55 }
0x11d8   :  { %v1382_v13 = vrot.slane %v1381_v11, 2  ;;  %v1394_v15 = vrot.slane %v1393_v0, 2  ;;  %v1401_v49 = vadd.f32 %v1400_v42, %v1399_v6 }
0x11d9   :  { %v1388_v16 = vrot.slane %v1387_v47, 2 }
0x11da   :  { %v1383_v17 = vadd.f32 %v1382_v13, %v1381_v11  ;;  %v1395_v19 = vadd.f32 %v1394_v15, %v1393_v0  ;;  %v1402_v20 = vrot.slane %v1401_v49, 2 }
0x11db   :  { %v1389_v21 = vadd.f32 %v1388_v16, %v1387_v47 }
0x11dc   :  { %v1384_v22 = vrot.slane %v1383_v17, 1  ;;  %v1396_v23 = vrot.slane %v1395_v19, 1  ;;  %v1403_v24 = vadd.f32 %v1402_v20, %v1401_v49 }
0x11dd   :  { %v1390_v26 = vrot.slane %v1389_v21, 1 }
0x11de   :  { %v1385_v59 = vadd.f32 %v1384_v22, %v1383_v17  ;;  %v1397_v27 = vadd.f32 %v1396_v23, %v1395_v19  ;;  %v1404_v28 = vrot.slane %v1403_v24, 1  ;;  %v1374_v23 = vld [vmem:[#allocation5 + $0x6] sm:$0xf] }
0x11df   :  { %v1391_v61 = vadd.f32 %v1390_v26, %v1389_v21  ;;  %v1469_v26 = vrot.slane %v1374_v23, %v2752_v31 }
0x11e0   :  { %v1408_v32 = vmul.f32 %v3033_v25, %v1385_v59  ;;  %v1410_v34 = vmul.f32 %v3033_v25, %v1397_v27  ;;  %v1405_v35 = vadd.f32 %v1404_v28, %v1403_v24  ;;  %v1375_v24 = vld [vmem:[#allocation5 + $0xa] sm:$0xf]  ;;  %v1477_v27 = vrot.slane %v1374_v23, %v3009_v53 }
0x11e1   :  { %v1409_v37 = vmul.f32 %v3033_v25, %v1391_v61 }
0x11e2   :  { %v1412_v38 = vsub.f32 %v1327_v56, %v1408_v32  ;;  %v1414_v43 = vsub.f32 %v1368_v58, %v1410_v34  ;;  %v1411_v39 = vmul.f32 %v3033_v25, %v1405_v35  ;;  %v1473_v32 = vrot.slane %v1374_v23, %v2755_v33 }
0x11e3   :  { %v1413_v51 = vsub.f32 %v1329_v8, %v1409_v37  ;;  %v1494_v34 = vrot.slane %v1375_v24, %v2752_v31 }
0x11e4   :  { %v1416_v41 = vmul.f32 %v1412_v38, %v1412_v38  ;;  %v1418_v45 = vmul.f32 %v1414_v43, %v1414_v43  ;;  %v1415_v29 = vsub.f32 %v1370_v30, %v1411_v39  ;;  %v1481_v39 = vrot.slane %v1374_v23, %v3015_v46 }
0x11e5   :  { %v1417_v44 = vmul.f32 %v1413_v51, %v1413_v51 }
0x11e6   :  { %v1420_v1 = vmul.f32 %v3026_v63, %v1416_v41  ;;  %v1422_v48 = vmul.f32 %v3026_v63, %v1418_v45  ;;  %v1419_v50 = vmul.f32 %v1415_v29, %v1415_v29  ;;  %v1502_v41 = vrot.slane %v1375_v24, %v3009_v53 }
0x11e7   :  { %v1421_v52 = vmul.f32 %v3026_v63, %v1417_v44 }
0x11e8   :  { %v1424_v3 = vrot.slane %v1420_v1, 4  ;;  %v1436_v54 = vrot.slane %v1422_v48, 4  ;;  %v1423_v7 = vmul.f32 %v3026_v63, %v1419_v50 }
0x11e9   :  { %v1430_v56 = vrot.slane %v1421_v52, 4 }
0x11ea   :  { %v1425_v58 = vadd.f32 %v1424_v3, %v1420_v1  ;;  %v1437_v60 = vadd.f32 %v1436_v54, %v1422_v48  ;;  %v1442_v62 = vsel %vm1398_vm8, %v1423_v7, 0.0  ;;  %v1498_v48 = vrot.slane %v1375_v24, %v2755_v33  ;;  %v2284_v33 = vld [vmem:[%s3105_s7] sm:$0xff]  }
0x11eb   :  { %v1431_v8 = vadd.f32 %v1430_v56, %v1421_v52  ;;  %v1443_v9 = vrot.slane %v1442_v62, 4  ;;  %v1506_v3 = vrot.slane %v1375_v24, %v3015_v46  ;;  %v2285_v46 = vld [vmem:[%s3105_s7 + $0x8] sm:$0xff]  }
0x11ec   :  { %v1426_v30 = vrot.slane %v1425_v58, 2  ;;  %v1438_v10 = vrot.slane %v1437_v60, 2 }
0x11ed   :  { %v1432_v12 = vrot.slane %v1431_v8, 2  ;;  %v1444_v2 = vadd.f32 %v1443_v9, %v1442_v62 }
0x11ee   :  { %v1427_v14 = vadd.f32 %v1426_v30, %v1425_v58  ;;  %v1439_v18 = vadd.f32 %v1438_v10, %v1437_v60  ;;  %v2287_v10 = vld [vmem:[%s3105_s7 + $0x18] sm:$0xff]  }
0x11ef   :  { %v1433_v55 = vadd.f32 %v1432_v12, %v1431_v8  ;;  %v1445_v4 = vrot.slane %v1444_v2, 2  ;;  %v2288_v12 = vld [vmem:[%s3105_s7 + $0x20] sm:$0xff]  }
0x11f0   :  { %v1428_v5 = vrot.slane %v1427_v14, 1  ;;  %v1440_v57 = vrot.slane %v1439_v18, 1 }
0x11f1   :  { %v1434_v40 = vrot.slane %v1433_v55, 1  ;;  %v1446_v6 = vadd.f32 %v1445_v4, %v1444_v2  ;;  %v2289_v2 = vld [vmem:[%s3105_s7 + $0x28] sm:$0xff]  }
0x11f2   :  { %v1429_v11 = vadd.f32 %v1428_v5, %v1427_v14  ;;  %v1441_v0 = vadd.f32 %v1440_v57, %v1439_v18  ;;  %v2290_v14 = vld [vmem:[%s3105_s7 + $0x30] ss:$0 sps:$4 sm:$0x33]   ;;  %v2083_v5 = vld [vmem:[#allocation5 + $0xe] ss:$0 sm:$0xff] }
0x11f3   :  { %v1435_v42 = vadd.f32 %v1434_v40, %v1433_v55  ;;  %v1447_v47 = vrot.slane %v1446_v6, 1  ;;  %v1919_v18 = vsel %vm1917_vm9, %v2290_v14, 0 }
0x11f4   :  { %v1449_v13 = vmul.f32 %v3033_v25, %v1429_v11  ;;  %v1451_v15 = vmul.f32 %v3033_v25, %v1441_v0 }
0x11f5   :  { %v1450_v49 = vmul.f32 %v3033_v25, %v1435_v42  ;;  %v1448_v16 = vadd.f32 %v1447_v47, %v1446_v6 }
0x11f6   :  { %v1453_v17 = vadd.f32 1e-05, %v1449_v13  ;;  %v1455_v19 = vadd.f32 1e-05, %v1451_v15 }
0x11f7   :  { %v1454_v20 = vadd.f32 1e-05, %v1450_v49  ;;  %v1452_v21 = vmul.f32 %v3033_v25, %v1448_v16 }
0x11f8   :  { %2389 = vrsqrt.f32 %v1453_v17 }
0x11f9   :  { %2391 = vrsqrt.f32 %v1455_v19  ;;  %v1456_v22 = vadd.f32 1e-05, %v1452_v21 }
0x11fa   :  { %2393 = vrsqrt.f32 %v1454_v20 }
0x11fb   :  { %2395 = vrsqrt.f32 %v1456_v22 }
0x1202   :  { %v2390_v59 = vpop.eup %2389 }
0x1203   :  { %v2392_v28 = vpop.eup %2391  ;;  %v1461_v61 = vmul.f32 %v2390_v59, %v1412_v38 }
0x1204   :  { %v2394_v35 = vpop.eup %2393  ;;  %v1463_v37 = vmul.f32 %v2392_v28, %v1414_v43 }
0x1205   :  { %v2396_v45 = vpop.eup %2395  ;;  %v1486_v44 = vmul.f32 %v1469_v26, %v1461_v61  ;;  %v1462_v1 = vmul.f32 %v2394_v35, %v1413_v51 }
0x1206   :  { %v1488_v50 = vmul.f32 %v1477_v27, %v1463_v37  ;;  %v1464_v52 = vmul.f32 %v2396_v45, %v1415_v29  ;;  %v2286_v29 = vld [vmem:[%s3105_s7 + $0x10] sm:$0xff]  }
0x1207   :  { %v1487_v38 = vmul.f32 %v1473_v32, %v1462_v1  ;;  %v1511_v54 = vadd.f32 %v1494_v34, %v1486_v44  ;;  %v2110_v44 = vld [vmem:[#allocation5 + $0xf] ss:$0 sm:$0xff] }
0x1208   :  { %v1489_v7 = vmul.f32 %v1481_v39, %v1464_v52  ;;  %v1513_v56 = vadd.f32 %v1502_v41, %v1488_v50 }
0x1209   :  { %v1512_v31 = vadd.f32 %v1498_v48, %v1487_v38  ;;  %v1515_v58 = vmax.f32 %v1511_v54, 0.0  ;;  %v2111_v48 = vld [vmem:[#allocation5 + $0x10] ss:$0 sm:$0xff]  ;;  %v2112_v38 = vld [vmem:[#allocation5 + $0x11] ss:$0 sm:$0xff] }
0x120a   :  { %v1514_v43 = vadd.f32 %v1506_v3, %v1489_v7  ;;  %v1517_v62 = vmax.f32 %v1513_v56, 0.0 }
0x120b   :  { %v1516_v60 = vmax.f32 %v1512_v31, 0.0  ;;  %v1519_v9 = vpack.c.bf16 %v1515_v58, %v1515_v58 }
0x120c   :  { %v1518_v8 = vmax.f32 %v1514_v43, 0.0  ;;  %v1521_v51 = vpack.c.bf16 %v1517_v62, %v1517_v62 }
0x120d   :  { %v1520_v53 = vpack.c.bf16 %v1516_v60, %v1516_v60 }
0x120e   :  { %v1522_v30 = vpack.c.bf16 %v1518_v8, %v1518_v8 }
0x120f   :  { %1765 = vmatprep.mubr.bf16.mxu1 %v1520_v53 }
0x1210   :  { %1766 = vmatmul.mubr.bf16.vlgmr.msra.gmra.mrb[32].mxu1 %v1519_v9  ;;  %2109 = vmatprep.mubr.msk.bf16.mxu0 %vm1398_vm8, %v1522_v30 }
0x1211   :  { %1806 = vmatmul.mubr.bf16.vlgmr.msra.gmra.mrb[40].mxu0 %v1521_v51  ;;  %2152 = vmatpush3.bf16.msra.mxu1 %v2284_v33 }
0x1212   :  { %2153 = vmatprep.subr.bf16.mxu1 %v2457_v36  ;;  %2165 = vmatprep.mubr.msk.bf16.mxu1 %vm2460_vm10, %v2457_v36 }
0x1215   :  { %2154 = vmatpush3.bf16.msra.mxu1 %v2285_v46 }
0x1216   :  { %2155 = vmatprep.subr.bf16.mxu1 %v2457_v36 }
0x1219   :  { %2156 = vmatpush3.bf16.msra.mxu1 %v2286_v29 }
0x121a   :  { %2157 = vmatprep.subr.bf16.mxu1 %v2457_v36 }
0x121d   :  { %2158 = vmatpush3.bf16.msra.mxu1 %v2287_v10 }
0x121e   :  { %2159 = vmatprep.subr.bf16.mxu1 %v2457_v36 }
0x1221   :  { %2160 = vmatpush3.bf16.msra.mxu1 %v2288_v12 }
0x1222   :  { %2161 = vmatprep.subr.bf16.mxu1 %v2457_v36 }
0x1225   :  { %2162 = vmatpush3.bf16.msra.mxu1 %v2289_v2 }
0x1226   :  { %2163 = vmatprep.subr.bf16.mxu1 %v2457_v36 }
0x1229   :  { %2164 = vmatpush3.bf16.msra.mxu1 %v1919_v18 }
0x12e3   :  { %v2137_v55 = vpop.f32.mrb[32].mxu1 }
0x12e4   :  { %v2138_v4 = vpop.f32.mrb[33].mxu1  ;;  %v1807_v57 = vpop.f32.mrb[40].mxu0 }
0x12e5   :  { %v2139_v40 = vadd.f32 %v2138_v4, %v2137_v55  ;;  %v2140_v6 = vpop.f32.mrb[34].mxu1  ;;  %v1809_v11 = vpop.f32.mrb[41].mxu0 }
0x12e6   :  { %v2141_v0 = vpop.f32.mrb[35].mxu1  ;;  %v1810_v42 = vpop.f32.mrb[42].mxu0 }
0x12e7   :  { %v1768_v47 = vadd.f32 %v2139_v40, %v2083_v5  ;;  %v1811_v13 = vpop.f32.mrb[43].mxu0 }
0x12e9   :  { %v1808_v15 = vadd.f32 %v1807_v57, %v1768_v47 }
0x12eb   :  { %v1815_v49 = vmul.f32 %v3026_v63, %v1808_v15 }
0x12ed   :  { %v1817_v16 = vsel %vm1816_vm12, %v1815_v49, 0.0 }
0x12ee   :  { %v1818_v17 = vrot.slane %v1817_v16, 4 }
0x12f0   :  { %v1819_v19 = vadd.f32 %v1818_v17, %v1817_v16 }
0x12f2   :  { %v1820_v36 = vrot.slane %v1819_v19, 2 }
0x12f4   :  { %v1821_v20 = vadd.f32 %v1820_v36, %v1819_v19 }
0x12f6   :  { %v1822_v21 = vrot.slane %v1821_v20, 1 }
0x12f8   :  { %v1823_v22 = vadd.f32 %v1822_v21, %v1821_v20 }
0x12fa   :  { %v1824_v23 = vmul.f32 %v3033_v25, %v1823_v22 }
0x12fc   :  { %v1825_v24 = vsub.f32 %v1808_v15, %v1824_v23 }
0x12fe   :  { %v1826_v26 = vmul.f32 %v1825_v24, %v1825_v24 }
0x1300   :  { %v1827_v59 = vmul.f32 %v3026_v63, %v1826_v26 }
0x1302   :  { %v1828_v27 = vsel %vm1816_vm12, %v1827_v59, 0.0 }
0x1303   :  { %v1829_v28 = vrot.slane %v1828_v27, 4 }
0x1305   :  { %v1830_v61 = vadd.f32 %v1829_v28, %v1828_v27 }
0x1307   :  { %v1831_v32 = vrot.slane %v1830_v61, 2 }
0x1309   :  { %v1832_v34 = vadd.f32 %v1831_v32, %v1830_v61 }
0x130b   :  { %v1833_v35 = vrot.slane %v1832_v34, 1 }
0x130d   :  { %v1834_v37 = vadd.f32 %v1833_v35, %v1832_v34 }
0x130f   :  { %v1835_v39 = vmul.f32 %v3033_v25, %v1834_v37 }
0x1311   :  { %v1836_v41 = vadd.f32 1e-05, %v1835_v39 }
0x1313   :  { %2397 = vrsqrt.f32 %v1836_v41 }
0x131d   :  { %v2398_v45 = vpop.eup %2397 }
0x131e   :  { %v1838_v1 = vmul.f32 %v2398_v45, %v1825_v24 }
0x1320   :  { %v1845_v50 = vmul.f32 %v2110_v44, %v1838_v1 }
0x1322   :  { %v1852_v52 = vadd.f32 %v2111_v48, %v1845_v50 }
0x1324   :  { %v1853_v3 = vmax.f32 %v1852_v52, 0.0 }
0x1326   :  { %v1854_v63 = vpack.c.bf16 %v1853_v3, %v1853_v3 }
0x1328   :  { %2166 = vmatmul.mubr.msk.bf16.vlgmr.msra.gmra.mrb[36].mxu1 %vm1816_vm12, %v1854_v63 }
0x13fb   :  { %v1955_v54 = vpop.f32.mrb[36].mxu1 }
0x13fc   :  { %v1956_v7 = vadd.f32 %v2112_v38, %v1955_v54  ;;  %v2167_v56 = vpop.f32.mrb[37].mxu1 }
0x13fd   :  { %v1958_v31 = vpop.f32.mrb[38].mxu1 }
0x13fe   :  { %v2168_v58 = vpop.f32.mrb[39].mxu1  ;;  %v1962_v25 = vsel %vm1961_vm13, %v1956_v7, -inf }
0x13ff   :  { %1963 = vmax.xlane.f32.xlu1 %v1962_v25 }
0x148c   :  { %v1964_v43 = vpop.xlane.xlu1 %1963 }
0x148d   :  { %v1965_v60 = vsub.f32 %v1956_v7, %v1964_v43 }
0x148f   :  { %v1966_v62 = vmul.f32 1.442695, %v1965_v60 }
0x1491   :  { %2399 = vpow2.f32 %v1966_v62 }
0x149b   :  { %v2400_v8 = vpop.eup %2399 }
0x149c   :  { %v1968_v53 = vsel %vm1961_vm13, %v2400_v8, 0.0 }
0x149d   :  { %1969 = vadd.xlane.f32.xlu0 %v1968_v53 }
0x152a   :  { %v1970_v9 = vpop.xlane.xlu0 %1969 }
0x152b   :  { %2401 = vrcp.f32 %v1970_v9 }
0x1535   :  { %v2402_v30 = vpop.eup %2401 }
0x1536   :  { %v1972_v51 = vmul.f32 %v2402_v30, %v2400_v8 }
0x1538   :  { %1973 = vst.msk [vmem:[%s3107_s9] sm:$0xff] %vm1961_vm13, %v1972_v51 }
0x1539   :  { %1978 = vsyncpa [#allocation4], 1 }
0x153a   :  { %1979 = vsyncpa [#allocation6], 1 }

</bundles_post_ra>
